<compile_context>
chip_gen: v7x
topology: tpu7x:2x2x1
jax: 0.10.0
libtpu: 0.0.40
codegen_flags: <defaults>
</compile_context>

<pallas_src>
import functools

import jax
import jax.numpy as jnp
from jax import lax
from jax.experimental import pallas as pl
from jax.experimental.pallas import tpu as pltpu


def _round_up(x, m):
    return -(-x // m) * m


def _largest_divisor(n, cap):
    """Largest divisor of n that is <= cap (>= 1)."""
    cap = max(1, min(int(cap), int(n)))
    for t in range(cap, 0, -1):
        if n % t == 0:
            return t
    return 1


def _pick_tile(extent, cap, mult):
    """Tile size: whole (rounded-up) extent if small, else the cap."""
    cap = max(mult, (cap // mult) * mult)
    ext = _round_up(extent, mult)
    return ext if ext <= cap else cap


def _shrink_tile(t, mult):
    if t <= mult:
        return mult
    return max(mult, _round_up(t // 2, mult))


def _vmem_estimate(hg, tq, tkv, d, m, csz, osz):
    """Per-grid-step VMEM footprint estimate (bytes), lane/sublane padded."""
    d_l = _round_up(d, 128)       # lane padding of the head dim
    tkv_l = _round_up(tkv, 128)   # lane padding of score tiles
    m_s = _round_up(m, 8)
    total = 0
    total += 2 * hg * tq * d_l * csz          # q blocks (double buffered)
    total += 2 * 2 * hg * tkv * d_l * csz     # k + v blocks
    total += 2 * 2 * hg * m_s * d_l * csz     # mem_k + mem_v blocks
    total += 2 * hg * tq * d_l * osz          # out blocks
    total += hg * tq * d_l * csz              # hoisted scaled-q scratch
    total += 2 * hg * tq * 128 * 4            # m / l scratch (lane padded)
    total += hg * tq * d_l * 4                # f32 output accumulator
    total += 2 * hg * tq * tkv_l * 4          # s / p f32 score temporaries
    return total


def _mem_flash_attn_kernel(q_ref, k_ref, v_ref, mk_ref, mv_ref, o_ref,
                           qs_sc, m_sc, l_sc, acc_sc, *,
                           kv_valid_len, kv_tile):
    """One (batch, head-group, q-tile) of memory-augmented attention.

    Grid: (B, H//HG, Sq//TQ, Skv//TKV); the last (KV) axis is an online-softmax
    reduction. Kernel refs (leading batch dim squeezed):
      q_ref  : (HG, TQ,  D)
      k_ref  : (HG, TKV, D)
      v_ref  : (HG, TKV, D)
      mk_ref : (HG, M,   D)   learned memory keys   (broadcast over batch)
      mv_ref : (HG, M,   D)   learned memory values (broadcast over batch)
      o_ref  : (HG, TQ,  D)
    Scratch: qs_sc (HG,TQ,D) compute dtype; m_sc/l_sc (HG,TQ,1) f32;
             acc_sc (HG,TQ,D) f32.
    """
    kv = pl.program_id(3)
    d = q_ref.shape[-1]

    @pl.when(kv == 0)
    def _init():
        # Hoisted q scaling: once per (batch, head-group, q-tile) into VMEM
        # scratch, reused by every KV step (frees VALU slots in the stream loop).
        # Scale the small operand (q) instead of the (TQ, TKV) scores.
        qs_sc[...] = (q_ref[...] * (d ** -0.5)).astype(qs_sc.dtype)
        qs = qs_sc[...]
        # Fold the learned memory k/v slots into the running softmax state.
        # This replaces the HBM round-trip concat of the original module.
        s_mem = jnp.einsum("hqd,hmd->hqm", qs, mk_ref[...],
                           preferred_element_type=jnp.float32)
        m0 = jnp.max(s_mem, axis=-1, keepdims=True)
        p_mem = jnp.exp(s_mem - m0)
        m_sc[...] = m0
        l_sc[...] = jnp.sum(p_mem, axis=-1, keepdims=True)
        acc_sc[...] = jnp.einsum("hqm,hmd->hqd", p_mem.astype(mv_ref.dtype),
                                 mv_ref[...],
                                 preferred_element_type=jnp.float32)

    # Online-softmax update with the current KV tile. Contraction is on D of
    # both operands -> no explicit k.T (no XLU transpose / VMEM copy).
    qs = qs_sc[...]
    s = jnp.einsum("hqd,hkd->hqk", qs, k_ref[...],
                   preferred_element_type=jnp.float32)
    if kv_valid_len is not None:
        # Only compiled in when Skv had to be padded up to a tile multiple:
        # mask the padded key columns out of the softmax.
        col = lax.broadcasted_iota(jnp.int32, s.shape, dimension=2)
        s = jnp.where(kv * kv_tile + col < kv_valid_len, s, -1e30)

    m_new = jnp.maximum(m_sc[...], jnp.max(s, axis=-1, keepdims=True))
    alpha = jnp.exp(m_sc[...] - m_new)
    p = jnp.exp(s - m_new)
    l_sc[...] = alpha * l_sc[...] + jnp.sum(p, axis=-1, keepdims=True)
    acc_sc[...] = alpha * acc_sc[...] + jnp.einsum(
        "hqk,hkd->hqd", p.astype(v_ref.dtype), v_ref[...],
        preferred_element_type=jnp.float32)
    m_sc[...] = m_new

    @pl.when(kv == pl.num_programs(3) - 1)
    def _finalize():
        l = l_sc[...]
        inv = pl.reciprocal(l, approx=True)      # EUP slot, ~free
        inv = inv * (2.0 - l * inv)              # one Newton step -> ~exact f32
        o_ref[...] = (acc_sc[...] * inv).astype(o_ref.dtype)


def memory_scale_attend_2d(q, k, v, mem_kv, attention_mask=None, *,
                           q_tile=512, kv_tile=1024, max_head_group=8,
                           compute_dtype=jnp.bfloat16):
    """Forward pass of MemoryScaleAttend2D (drop_prob=0.0 -> dropout = identity).

    q, k, v : (B, H, S, D); mem_kv : (2, H, M, D). Returns (B, H, Sq, D), q.dtype.
    """
    if attention_mask is not None:
        # TODO(synk): attention_mask path not implemented (module used with mask=None).
        raise NotImplementedError("attention_mask is not supported by this kernel")

    B, H, Sq, D = q.shape
    Skv = k.shape[2]
    M = mem_kv.shape[2]
    out_dtype = q.dtype

    # bf16 MXU path: native MXU throughput on v5e/v6e/v7x, half the K/V HBM
    # traffic, native (16,128) layout. Accumulation stays f32 in the kernel.
    if compute_dtype is not None:
        q = q.astype(compute_dtype)
        k = k.astype(compute_dtype)
        v = v.astype(compute_dtype)
        mem_kv = mem_kv.astype(compute_dtype)
    cdtype = q.dtype
    csz = jnp.dtype(cdtype).itemsize
    osz = jnp.dtype(out_dtype).itemsize
    mult = {1: 32, 2: 16}.get(csz, 8)          # dtype-aware sublane multiple

    # ---- per-generation VMEM budget (v5e/v6e: 128 MiB, v7x: 64 MiB) ----
    try:
        vmem_cap = int(pltpu.get_tpu_info().vmem_capacity_bytes)
    except Exception:
        vmem_cap = 64 * 1024 * 1024            # conservative (v7x-sized) fallback
    vmem_limit = int(vmem_cap * 0.85)          # headroom for Mosaic internal scratch
    budget = int(vmem_limit * 0.9)

    # ---- tile selection, shrunk to fit the budget ----
    HG = _largest_divisor(H, max_head_group)   # heads per grid step
    TQ = _pick_tile(Sq, q_tile, mult)          # q rows per step
    TKV = _pick_tile(Skv, kv_tile, mult)       # kv rows per step
    for _ in range(64):
        if _vmem_estimate(HG, TQ, TKV, D, M, csz, osz) <= budget:
            break
        if HG > 4:                             # v7x: halve head-group first
            HG = _largest_divisor(H, HG // 2)
        elif TKV > max(512, mult):
            TKV = _shrink_tile(TKV, mult)
        elif TQ > max(256, mult):
            TQ = _shrink_tile(TQ, mult)
        elif TKV > mult:
            TKV = _shrink_tile(TKV, mult)
        elif TQ > mult:
            TQ = _shrink_tile(TQ, mult)
        elif HG > 1:
            HG = _largest_divisor(H, HG - 1)
        else:
            break

    # ---- pad sequence lengths to tile multiples (no full-extent fallback) ----
    Sq_pad = _round_up(Sq, TQ)
    Skv_pad = _round_up(Skv, TKV)
    if Sq_pad != Sq:
        q = jnp.pad(q, ((0, 0), (0, 0), (0, Sq_pad - Sq), (0, 0)))
    if Skv_pad != Skv:
        pad = ((0, 0), (0, 0), (0, Skv_pad - Skv), (0, 0))
        k = jnp.pad(k, pad)
        v = jnp.pad(v, pad)

    mem_k = mem_kv[0]   # (H, M, D), broadcast over batch inside the kernel
    mem_v = mem_kv[1]

    grid = (B, H // HG, Sq_pad // TQ, Skv_pad // TKV)

    q_spec = pl.BlockSpec((pl.Squeezed(), HG, TQ, D),
                          lambda b, hg, qi, kv: (b, hg, qi, 0))
    kv_spec = pl.BlockSpec((pl.Squeezed(), HG, TKV, D),
                           lambda b, hg, qi, kv: (b, hg, kv, 0))
    mem_spec = pl.BlockSpec((HG, M, D), lambda b, hg, qi, kv: (hg, 0, 0))
    out_spec = pl.BlockSpec((pl.Squeezed(), HG, TQ, D),
                            lambda b, hg, qi, kv: (b, hg, qi, 0))

    kernel = functools.partial(
        _mem_flash_attn_kernel,
        kv_valid_len=(Skv if Skv_pad != Skv else None),
        kv_tile=TKV)

    # Advisory cost estimate so XLA schedules neighbours around the long call.
    n_q_tiles = Sq_pad // TQ
    flops = 4 * B * H * Sq * (Skv + M) * D
    bytes_accessed = (q.size * csz                          # q read once
                      + B * H * Sq_pad * D * osz            # output write
                      + (k.size + v.size) * csz * n_q_tiles # K/V re-streamed per q-tile
                      + 2 * B * H * M * D * csz * n_q_tiles)
    cost = pl.CostEstimate(flops=int(flops),
                           transcendentals=int(B * H * Sq * (Skv + M)),
                           bytes_accessed=int(bytes_accessed))

    out = pl.pallas_call(
        kernel,
        out_shape=jax.ShapeDtypeStruct((B, H, Sq_pad, D), out_dtype),
        grid_spec=pltpu.PrefetchScalarGridSpec(
            num_scalar_prefetch=0,
            grid=grid,
            in_specs=[q_spec, kv_spec, kv_spec, mem_spec, mem_spec],
            out_specs=out_spec,
            scratch_shapes=[
                pltpu.VMEM((HG, TQ, D), cdtype),       # hoisted scaled q
                pltpu.VMEM((HG, TQ, 1), jnp.float32),  # running max m
                pltpu.VMEM((HG, TQ, 1), jnp.float32),  # running denom l
                pltpu.VMEM((HG, TQ, D), jnp.float32),  # output accumulator
            ],
        ),
        compiler_params=pltpu.CompilerParams(
            # Batch / head-group / q-tile shard across TensorCores (v7x megacore);
            # KV axis is the sequential online-softmax reduction.
            dimension_semantics=("parallel", "parallel", "parallel", "arbitrary"),
            vmem_limit_bytes=vmem_limit,
        ),
        cost_estimate=cost,
    )(q, k, v, mem_k, mem_v)

    if Sq_pad != Sq:
        out = out[:, :, :Sq, :]
    return out


def _reference(q, k, v, mem_kv):
    B = q.shape[0]
    mk = jnp.broadcast_to(mem_kv[0][None], (B,) + mem_kv[0].shape)
    mv = jnp.broadcast_to(mem_kv[1][None], (B,) + mem_kv[1].shape)
    k_full = jnp.concatenate([mk, k], axis=-2)
    v_full = jnp.concatenate([mv, v], axis=-2)
    scale = q.shape[-1] ** (-0.5)
    sim = jnp.einsum("bhid,bhjd->bhij", q, k_full) * scale
    attn = jax.nn.softmax(sim, axis=-1)
    return jnp.einsum("bhij,bhjd->bhid", attn, v_full)


if __name__ == "__main__":
    # Small shapes consistent with the module:
    B, H, S, D, M = 2, 4, 8, 32, 4   # batch, n_heads, seq, head_dim, n_mem_size

    key = jax.random.PRNGKey(0)
    kq, kk, kv_, km = jax.random.split(key, 4)
    q = jax.random.normal(kq, (B, H, S, D), dtype=jnp.float32)
    k = jax.random.normal(kk, (B, H, S, D), dtype=jnp.float32)
    v = jax.random.normal(kv_, (B, H, S, D), dtype=jnp.float32)
    # deterministic init of the module parameter self.mem_kv ~ randn(2, H, M, D)
    mem_kv = jax.random.normal(km, (2, H, M, D), dtype=jnp.float32)

    out = memory_scale_attend_2d(q, k, v, mem_kv)
    out = jax.block_until_ready(out)

    ref = _reference(q, k, v, mem_kv)
    assert out.shape == (B, H, S, D)
    assert out.dtype == q.dtype
    max_err = float(jnp.max(jnp.abs(out - ref)))
    # bf16 MXU compute path (f32 accumulation) -> relaxed tolerance vs f32 ref.
    assert jnp.allclose(out, ref, atol=5e-2, rtol=5e-2), f"mismatch vs reference, max_err={max_err}"
    print("KERNEL_OK")
</pallas_src>

<mosaic_0001>
module attributes {stable_mosaic.version = 11 : i64} {
  func.func @_mem_flash_attn_kernel(%arg0: i32, %arg1: i32, %arg2: i32, %arg3: i32, %arg4: memref<1x4x16x32xbf16, #tpu.memory_space<vmem>>, %arg5: memref<1x4x16x32xbf16, #tpu.memory_space<vmem>>, %arg6: memref<1x4x16x32xbf16, #tpu.memory_space<vmem>>, %arg7: memref<4x4x32xbf16, #tpu.memory_space<vmem>>, %arg8: memref<4x4x32xbf16, #tpu.memory_space<vmem>>, %arg9: memref<1x4x16x32xf32, #tpu.memory_space<vmem>>, %arg10: memref<4x16x32xbf16, #tpu.memory_space<vmem>>, %arg11: memref<4x16x1xf32, #tpu.memory_space<vmem>>, %arg12: memref<4x16x1xf32, #tpu.memory_space<vmem>>, %arg13: memref<4x16x32xf32, #tpu.memory_space<vmem>>) attributes {dimension_semantics = [#tpu.dimension_semantics<parallel>, #tpu.dimension_semantics<parallel>, #tpu.dimension_semantics<parallel>, #tpu.dimension_semantics<arbitrary>], iteration_bounds = array<i64: 2, 1, 1, 1>, scalar_prefetch = 0 : i64, scratch_operands = 4 : i64, tpu.core_type = #tpu.core_type<tc>, window_params = [{transform_indices = @transform_0, window_bounds = array<i64: 1, 4, 16, 32>}, {transform_indices = @transform_1, window_bounds = array<i64: 1, 4, 16, 32>}, {transform_indices = @transform_2, window_bounds = array<i64: 1, 4, 16, 32>}, {transform_indices = @transform_3, window_bounds = array<i64: 4, 4, 32>}, {transform_indices = @transform_4, window_bounds = array<i64: 4, 4, 32>}, {transform_indices = @transform_5, window_bounds = array<i64: 1, 4, 16, 32>}]} {
    %c0_i32 = arith.constant 0 : i32
    %0 = arith.cmpi eq, %arg3, %c0_i32 : i32
    %1 = arith.extui %0 : i1 to i32
    %c0_i32_0 = arith.constant 0 : i32
    %2 = arith.cmpi ne, %1, %c0_i32_0 : i32
    scf.if %2 {
      %c0_38 = arith.constant 0 : index
      %c0_39 = arith.constant 0 : index
      %c0_40 = arith.constant 0 : index
      %c0_41 = arith.constant 0 : index
      %44 = vector.load %arg4[%c0_38, %c0_39, %c0_40, %c0_41] : memref<1x4x16x32xbf16, #tpu.memory_space<vmem>>, vector<1x4x16x32xbf16>
      %45 = vector.shape_cast %44 : vector<1x4x16x32xbf16> to vector<4x16x32xbf16>
      %cst_42 = arith.constant 1.767580e-01 : bf16
      %46 = vector.broadcast %cst_42 : bf16 to vector<4x16x32xbf16>
      %47 = arith.mulf %45, %46 : vector<4x16x32xbf16>
      %c0_43 = arith.constant 0 : index
      %c0_44 = arith.constant 0 : index
      %c0_45 = arith.constant 0 : index
      %48 = vector.load %arg10[%c0_43, %c0_44, %c0_45] : memref<4x16x32xbf16, #tpu.memory_space<vmem>>, vector<4x16x32xbf16>
      tpu.vector_store %arg10[%c0_43, %c0_44, %c0_45], %47 {strides = array<i32>} : memref<4x16x32xbf16, #tpu.memory_space<vmem>>, vector<4x16x32xbf16>,
      %c0_46 = arith.constant 0 : index
      %c0_47 = arith.constant 0 : index
      %c0_48 = arith.constant 0 : index
      %49 = vector.load %arg10[%c0_46, %c0_47, %c0_48] : memref<4x16x32xbf16, #tpu.memory_space<vmem>>, vector<4x16x32xbf16>
      %c0_49 = arith.constant 0 : index
      %c0_50 = arith.constant 0 : index
      %c0_51 = arith.constant 0 : index
      %50 = vector.load %arg7[%c0_49, %c0_50, %c0_51] : memref<4x4x32xbf16, #tpu.memory_space<vmem>>, vector<4x4x32xbf16>
      "tpu.trace_start"() <{level = 10 : i32, message = "hqd,hmd->hqm"}> : () -> ()
      %cst_52 = arith.constant dense<0.000000e+00> : vector<4x16x4xf32>
      %51 = tpu.matmul %49, %50, %cst_52 {dimension_numbers = #tpu.dot_dimension_numbers<[2], [2], [1], [1], [0, 0, 0, 1, 1, 1], [0], [0]>} : vector<4x16x32xbf16>, vector<4x4x32xbf16>, vector<4x16x4xf32> -> vector<4x16x4xf32>
      "tpu.trace_stop"() : () -> ()
      %cst_53 = arith.constant dense<0xFF800000> : vector<4x16xf32>
      %52 = vector.multi_reduction <maximumf>, %51, %cst_53 [2] : vector<4x16x4xf32> to vector<4x16xf32>
      %53 = vector.shape_cast %52 : vector<4x16xf32> to vector<4x16x1xf32>
      %54 = vector.broadcast %53 : vector<4x16x1xf32> to vector<4x16x4xf32>
      %55 = arith.subf %51, %54 : vector<4x16x4xf32>
      %56 = math.exp %55 : vector<4x16x4xf32>
      %c0_54 = arith.constant 0 : index
      %c0_55 = arith.constant 0 : index
      %c0_56 = arith.constant 0 : index
      %57 = vector.load %arg11[%c0_54, %c0_55, %c0_56] : memref<4x16x1xf32, #tpu.memory_space<vmem>>, vector<4x16x1xf32>
      tpu.vector_store %arg11[%c0_54, %c0_55, %c0_56], %53 {strides = array<i32>} : memref<4x16x1xf32, #tpu.memory_space<vmem>>, vector<4x16x1xf32>,
      %cst_57 = arith.constant dense<0.000000e+00> : vector<4x16xf32>
      %58 = vector.multi_reduction <add>, %56, %cst_57 [2] : vector<4x16x4xf32> to vector<4x16xf32>
      %59 = vector.shape_cast %58 : vector<4x16xf32> to vector<4x16x1xf32>
      %c0_58 = arith.constant 0 : index
      %c0_59 = arith.constant 0 : index
      %c0_60 = arith.constant 0 : index
      %60 = vector.load %arg12[%c0_58, %c0_59, %c0_60] : memref<4x16x1xf32, #tpu.memory_space<vmem>>, vector<4x16x1xf32>
      tpu.vector_store %arg12[%c0_58, %c0_59, %c0_60], %59 {strides = array<i32>} : memref<4x16x1xf32, #tpu.memory_space<vmem>>, vector<4x16x1xf32>,
      %61 = arith.truncf %56 : vector<4x16x4xf32> to vector<4x16x4xbf16>
      %c0_61 = arith.constant 0 : index
      %c0_62 = arith.constant 0 : index
      %c0_63 = arith.constant 0 : index
      %62 = vector.load %arg8[%c0_61, %c0_62, %c0_63] : memref<4x4x32xbf16, #tpu.memory_space<vmem>>, vector<4x4x32xbf16>
      "tpu.trace_start"() <{level = 10 : i32, message = "hqm,hmd->hqd"}> : () -> ()
      %cst_64 = arith.constant dense<0.000000e+00> : vector<4x16x32xf32>
      %63 = tpu.matmul %61, %62, %cst_64 {dimension_numbers = #tpu.dot_dimension_numbers<[2], [1], [1], [2], [0, 0, 0, 1, 1, 2], [0], [0]>} : vector<4x16x4xbf16>, vector<4x4x32xbf16>, vector<4x16x32xf32> -> vector<4x16x32xf32>
      "tpu.trace_stop"() : () -> ()
      %c0_65 = arith.constant 0 : index
      %c0_66 = arith.constant 0 : index
      %c0_67 = arith.constant 0 : index
      %64 = vector.load %arg13[%c0_65, %c0_66, %c0_67] : memref<4x16x32xf32, #tpu.memory_space<vmem>>, vector<4x16x32xf32>
      tpu.vector_store %arg13[%c0_65, %c0_66, %c0_67], %63 {strides = array<i32>} : memref<4x16x32xf32, #tpu.memory_space<vmem>>, vector<4x16x32xf32>,
    } else {
    }
    %c0 = arith.constant 0 : index
    %c0_1 = arith.constant 0 : index
    %c0_2 = arith.constant 0 : index
    %3 = vector.load %arg10[%c0, %c0_1, %c0_2] : memref<4x16x32xbf16, #tpu.memory_space<vmem>>, vector<4x16x32xbf16>
    %c0_3 = arith.constant 0 : index
    %c0_4 = arith.constant 0 : index
    %c0_5 = arith.constant 0 : index
    %c0_6 = arith.constant 0 : index
    %4 = vector.load %arg5[%c0_3, %c0_4, %c0_5, %c0_6] : memref<1x4x16x32xbf16, #tpu.memory_space<vmem>>, vector<1x4x16x32xbf16>
    %5 = vector.shape_cast %4 : vector<1x4x16x32xbf16> to vector<4x16x32xbf16>
    "tpu.trace_start"() <{level = 10 : i32, message = "hqd,hkd->hqk"}> : () -> ()
    %cst = arith.constant dense<0.000000e+00> : vector<4x16x16xf32>
    %6 = tpu.matmul %3, %5, %cst {dimension_numbers = #tpu.dot_dimension_numbers<[2], [2], [1], [1], [0, 0, 0, 1, 1, 1], [0], [0]>} : vector<4x16x32xbf16>, vector<4x16x32xbf16>, vector<4x16x16xf32> -> vector<4x16x16xf32>
    "tpu.trace_stop"() : () -> ()
    %7 = tpu.iota {dimensions = array<i32: 2>} : vector<4x16x16xi32>
    %c16_i32 = arith.constant 16 : i32
    %8 = arith.muli %arg3, %c16_i32 : i32
    %9 = vector.broadcast %8 : i32 to vector<4x16x16xi32>
    %10 = arith.addi %9, %7 : vector<4x16x16xi32>
    %c8_i32 = arith.constant 8 : i32
    %11 = vector.broadcast %c8_i32 : i32 to vector<4x16x16xi32>
    %12 = arith.cmpi slt, %10, %11 : vector<4x16x16xi32>
    %cst_7 = arith.constant -1.000000e+30 : f32
    %13 = vector.broadcast %cst_7 : f32 to vector<4x16x16xf32>
    %14 = arith.select %12, %6, %13 : vector<4x16x16xi1>, vector<4x16x16xf32>
    %c0_8 = arith.constant 0 : index
    %c0_9 = arith.constant 0 : index
    %c0_10 = arith.constant 0 : index
    %15 = vector.load %arg11[%c0_8, %c0_9, %c0_10] : memref<4x16x1xf32, #tpu.memory_space<vmem>>, vector<4x16x1xf32>
    %cst_11 = arith.constant dense<0xFF800000> : vector<4x16xf32>
    %16 = vector.multi_reduction <maximumf>, %14, %cst_11 [2] : vector<4x16x16xf32> to vector<4x16xf32>
    %17 = vector.shape_cast %16 : vector<4x16xf32> to vector<4x16x1xf32>
    %18 = arith.maximumf %15, %17 : vector<4x16x1xf32>
    %c0_12 = arith.constant 0 : index
    %c0_13 = arith.constant 0 : index
    %c0_14 = arith.constant 0 : index
    %19 = vector.load %arg11[%c0_12, %c0_13, %c0_14] : memref<4x16x1xf32, #tpu.memory_space<vmem>>, vector<4x16x1xf32>
    %20 = arith.subf %19, %18 : vector<4x16x1xf32>
    %21 = math.exp %20 : vector<4x16x1xf32>
    %22 = vector.broadcast %18 : vector<4x16x1xf32> to vector<4x16x16xf32>
    %23 = arith.subf %14, %22 : vector<4x16x16xf32>
    %24 = math.exp %23 : vector<4x16x16xf32>
    %c0_15 = arith.constant 0 : index
    %c0_16 = arith.constant 0 : index
    %c0_17 = arith.constant 0 : index
    %25 = vector.load %arg12[%c0_15, %c0_16, %c0_17] : memref<4x16x1xf32, #tpu.memory_space<vmem>>, vector<4x16x1xf32>
    %26 = arith.mulf %21, %25 : vector<4x16x1xf32>
    %cst_18 = arith.constant dense<0.000000e+00> : vector<4x16xf32>
    %27 = vector.multi_reduction <add>, %24, %cst_18 [2] : vector<4x16x16xf32> to vector<4x16xf32>
    %28 = vector.shape_cast %27 : vector<4x16xf32> to vector<4x16x1xf32>
    %29 = arith.addf %26, %28 : vector<4x16x1xf32>
    %c0_19 = arith.constant 0 : index
    %c0_20 = arith.constant 0 : index
    %c0_21 = arith.constant 0 : index
    %30 = vector.load %arg12[%c0_19, %c0_20, %c0_21] : memref<4x16x1xf32, #tpu.memory_space<vmem>>, vector<4x16x1xf32>
    tpu.vector_store %arg12[%c0_19, %c0_20, %c0_21], %29 {strides = array<i32>} : memref<4x16x1xf32, #tpu.memory_space<vmem>>, vector<4x16x1xf32>,
    %c0_22 = arith.constant 0 : index
    %c0_23 = arith.constant 0 : index
    %c0_24 = arith.constant 0 : index
    %31 = vector.load %arg13[%c0_22, %c0_23, %c0_24] : memref<4x16x32xf32, #tpu.memory_space<vmem>>, vector<4x16x32xf32>
    %32 = vector.broadcast %21 : vector<4x16x1xf32> to vector<4x16x32xf32>
    %33 = arith.mulf %32, %31 : vector<4x16x32xf32>
    %34 = arith.truncf %24 : vector<4x16x16xf32> to vector<4x16x16xbf16>
    %c0_25 = arith.constant 0 : index
    %c0_26 = arith.constant 0 : index
    %c0_27 = arith.constant 0 : index
    %c0_28 = arith.constant 0 : index
    %35 = vector.load %arg6[%c0_25, %c0_26, %c0_27, %c0_28] : memref<1x4x16x32xbf16, #tpu.memory_space<vmem>>, vector<1x4x16x32xbf16>
    %36 = vector.shape_cast %35 : vector<1x4x16x32xbf16> to vector<4x16x32xbf16>
    "tpu.trace_start"() <{level = 10 : i32, message = "hqk,hkd->hqd"}> : () -> ()
    %cst_29 = arith.constant dense<0.000000e+00> : vector<4x16x32xf32>
    %37 = tpu.matmul %34, %36, %cst_29 {dimension_numbers = #tpu.dot_dimension_numbers<[2], [1], [1], [2], [0, 0, 0, 1, 1, 2], [0], [0]>} : vector<4x16x16xbf16>, vector<4x16x32xbf16>, vector<4x16x32xf32> -> vector<4x16x32xf32>
    "tpu.trace_stop"() : () -> ()
    %38 = arith.addf %33, %37 : vector<4x16x32xf32>
    %c0_30 = arith.constant 0 : index
    %c0_31 = arith.constant 0 : index
    %c0_32 = arith.constant 0 : index
    %39 = vector.load %arg13[%c0_30, %c0_31, %c0_32] : memref<4x16x32xf32, #tpu.memory_space<vmem>>, vector<4x16x32xf32>
    tpu.vector_store %arg13[%c0_30, %c0_31, %c0_32], %38 {strides = array<i32>} : memref<4x16x32xf32, #tpu.memory_space<vmem>>, vector<4x16x32xf32>,
    %c0_33 = arith.constant 0 : index
    %c0_34 = arith.constant 0 : index
    %c0_35 = arith.constant 0 : index
    %40 = vector.load %arg11[%c0_33, %c0_34, %c0_35] : memref<4x16x1xf32, #tpu.memory_space<vmem>>, vector<4x16x1xf32>
    tpu.vector_store %arg11[%c0_33, %c0_34, %c0_35], %18 {strides = array<i32>} : memref<4x16x1xf32, #tpu.memory_space<vmem>>, vector<4x16x1xf32>,
    %c0_i32_36 = arith.constant 0 : i32
    %41 = arith.cmpi eq, %arg3, %c0_i32_36 : i32
    %42 = arith.extui %41 : i1 to i32
    %c0_i32_37 = arith.constant 0 : i32
    %43 = arith.cmpi ne, %42, %c0_i32_37 : i32
    scf.if %43 {
      %c0_38 = arith.constant 0 : index
      %c0_39 = arith.constant 0 : index
      %c0_40 = arith.constant 0 : index
      %44 = vector.load %arg12[%c0_38, %c0_39, %c0_40] : memref<4x16x1xf32, #tpu.memory_space<vmem>>, vector<4x16x1xf32>
      %45 = tpu.reciprocal %44 {approx = true} : vector<4x16x1xf32> -> vector<4x16x1xf32>
      %46 = arith.mulf %44, %45 : vector<4x16x1xf32>
      %cst_41 = arith.constant 2.000000e+00 : f32
      %47 = vector.broadcast %cst_41 : f32 to vector<4x16x1xf32>
      %48 = arith.subf %47, %46 : vector<4x16x1xf32>
      %49 = arith.mulf %45, %48 : vector<4x16x1xf32>
      %c0_42 = arith.constant 0 : index
      %c0_43 = arith.constant 0 : index
      %c0_44 = arith.constant 0 : index
      %50 = vector.load %arg13[%c0_42, %c0_43, %c0_44] : memref<4x16x32xf32, #tpu.memory_space<vmem>>, vector<4x16x32xf32>
      %51 = vector.broadcast %49 : vector<4x16x1xf32> to vector<4x16x32xf32>
      %52 = arith.mulf %50, %51 : vector<4x16x32xf32>
      %c0_45 = arith.constant 0 : index
      %c0_46 = arith.constant 0 : index
      %c0_47 = arith.constant 0 : index
      %c0_48 = arith.constant 0 : index
      %53 = vector.load %arg9[%c0_45, %c0_46, %c0_47, %c0_48] : memref<1x4x16x32xf32, #tpu.memory_space<vmem>>, vector<1x4x16x32xf32>
      %54 = vector.shape_cast %53 : vector<1x4x16x32xf32> to vector<4x16x32xf32>
      %55 = vector.shape_cast %52 : vector<4x16x32xf32> to vector<1x4x16x32xf32>
      tpu.vector_store %arg9[%c0_45, %c0_46, %c0_47, %c0_48], %55 {strides = array<i32>} : memref<1x4x16x32xf32, #tpu.memory_space<vmem>>, vector<1x4x16x32xf32>,
    } else {
    }
    return
  }
  func.func @transform_0(%arg0: i32, %arg1: i32, %arg2: i32, %arg3: i32) -> (i32, i32, i32, i32) {
    %c0_i32 = arith.constant 0 : i32
    %c0_i32_0 = arith.constant 0 : i32
    return %arg0, %arg1, %arg2, %c0_i32 : i32, i32, i32, i32
  }
  func.func @transform_1(%arg0: i32, %arg1: i32, %arg2: i32, %arg3: i32) -> (i32, i32, i32, i32) {
    %c0_i32 = arith.constant 0 : i32
    %c0_i32_0 = arith.constant 0 : i32
    return %arg0, %arg1, %arg3, %c0_i32 : i32, i32, i32, i32
  }
  func.func @transform_2(%arg0: i32, %arg1: i32, %arg2: i32, %arg3: i32) -> (i32, i32, i32, i32) {
    %c0_i32 = arith.constant 0 : i32
    %c0_i32_0 = arith.constant 0 : i32
    return %arg0, %arg1, %arg3, %c0_i32 : i32, i32, i32, i32
  }
  func.func @transform_3(%arg0: i32, %arg1: i32, %arg2: i32, %arg3: i32) -> (i32, i32, i32) {
    %c0_i32 = arith.constant 0 : i32
    %c0_i32_0 = arith.constant 0 : i32
    %c0_i32_1 = arith.constant 0 : i32
    return %arg1, %c0_i32, %c0_i32_0 : i32, i32, i32
  }
  func.func @transform_4(%arg0: i32, %arg1: i32, %arg2: i32, %arg3: i32) -> (i32, i32, i32) {
    %c0_i32 = arith.constant 0 : i32
    %c0_i32_0 = arith.constant 0 : i32
    %c0_i32_1 = arith.constant 0 : i32
    return %arg1, %c0_i32, %c0_i32_0 : i32, i32, i32
  }
  func.func @transform_5(%arg0: i32, %arg1: i32, %arg2: i32, %arg3: i32) -> (i32, i32, i32, i32) {
    %c0_i32 = arith.constant 0 : i32
    %c0_i32_0 = arith.constant 0 : i32
    return %arg0, %arg1, %arg2, %c0_i32 : i32, i32, i32, i32
  }
}

</mosaic_0001>

<bundles_post_ra>
// kernel: tpu_custom_call.1
= control target key start
LH: loop header
LB: loop body
LE: loop exit
PB: predicated region body
PF: predicated region fallthrough
CT: control target
= control target key end

     0   :  { %s3308_s0 = inlined_call_operand.hbm [shape: bf16[2,4,16,32], index: 0, kind: input, shape index: {}]   ;;  %s3309_s1 = inlined_call_operand.hbm [shape: bf16[2,4,16,32], index: 1, kind: input, shape index: {}]   ;;  %s3310_s2 = inlined_call_operand.hbm [shape: bf16[2,4,16,32], index: 2, kind: input, shape index: {}]   ;;  %s3311_s3 = inlined_call_operand.vmem [shape: bf16[4,4,32], index: 3, kind: input, shape index: {}]   ;;  %s3312_s4 = inlined_call_operand.hbm [shape: bf16[4,4,32], index: 4, kind: input, shape index: {}]   ;;  %s3313_s5 = inlined_call_operand.hbm [shape: f32[2,4,16,32], index: 5, kind: output, shape index: {}]  }
   0x1   :  { %3337 = sst [smem:[#allocation26_spill]] %s3309_s1 }
   0x2   :  { %3338 = sst [smem:[#allocation27_spill]] %s3313_s5 }
   0x3   :  { %10 = vsyncpa [#allocation7], 0 }
   0x4   :  { %12 = vsyncpa [#allocation7 + $0x1], 0 }
   0x5   :  { %13 = vsyncpa [#allocation10], 0 }
   0x6   :  { %15 = vsyncpa [#allocation10 + $0x1], 0 }
   0x7   :  { %16 = vsyncpa [#allocation13], 0 }
   0x8   :  { %17 = vsyncpa [#allocation8], 0 }
   0x9   :  { %19 = vsyncpa [#allocation8 + $0x1], 0  ;;  %s2595_s18 = smov 0   ;;  %s2597_s19 = smov 0  }
   0xa   :  { %s2599_s20 = smov 0   ;;  %s2601_s21 = smov 0  }
   0xb   :  { %s2603_s22 = smov 0   ;;  %s2605_s23 = smov 0  }
   0xc LB: > { %3339 = sst [smem:[#allocation19_spill]] %s2529_s18  ;;  %s51_s24 = sadd.s32 1, %s2545_s22  ;;  %s2549_s23 = sphi %s2605_s23, %s25_s23   ;;  %s2545_s22 = sphi %s2603_s22, %s3374_s22   ;;  %s2541_s21 = sphi %s2601_s21, %s3373_s21   ;;  %s2537_s20 = sphi %s2599_s20, %s3377_s20   ;;  %s2533_s19 = sphi %s2597_s19, %s3376_s19   ;;  %s2529_s18 = sphi %s2595_s18, %s3375_s18  }
   0xd   : > { %3340 = sst [smem:[#allocation20_spill]] %s2545_s22  ;;  %s62_s25 = sadd.s32 1, %s2537_s20 }
   0xe   : > { %3341 = sst [smem:[#allocation21_spill]] %s2549_s23  ;;  %p53_p0 = scmp.ge.s32.totalorder %s51_s24, 2 }
   0xf   : > { %p3314_p1 = scmp.ne.s32.totalorder %s2537_s20, %s2533_s19  ;;  %p70_p2 = scmp.eq.s32.totalorder %s2549_s23, 0 }
  0x10   : > { %s3379_s24 = smov (%p53_p0, %s51_s24), 0  ;;  %p2206_p5 = scmp.lt.s32.totalorder %s2549_s23, 2 }
  0x11   : > { %3342 = sst [smem:[#allocation22_spill]] %s3379_s24  ;;  %p71_p4 = por %p70_p2, %p3314_p1 }
  0x12   : > { %s55_s26 = ssub.s32 %s2545_s22, %s3379_s24  ;;  %s3319_s27 = sand.u32 1, %s2537_s20  }
  0x13   : > { %p60_p6 = scmp.eq.s32.totalorder %s55_s26, 0  ;;  %s2642_s28 = sshll.u32 %s3319_s27, 5 }
  0x14   : > { %s2645_s29 = sshll.u32 %s2545_s22, 9  ;;  %p2647_p7 = pnand %p2206_p5, %p71_p4 }
  0x15   : > { %s2652_s6 = scalar_select %p60_p6, %s2537_s20, %s62_s25  }
  0x16   : > { %s3343_s30 = scalar_select %p2647_p7, 1, 0 }
  0x17   : > { %3344 = sst [smem:[#allocation23_spill]] %s2652_s6  ;;  %s292_s7 = sand.u32 1, %s2549_s23  }
  0x18   : > { %s3345_s1 = sld [smem:[#allocation26_spill]]  ;;  %s296_s11 = scalar_lea.vmem [#allocation9], %s2642_s28 }
  0x19   : > { %s308_s12 = sshll.u32 %s296_s11, 4  ;;  %s2664_s13 = scalar_lea.sflag [#allocation10], %s292_s7  ;;  %s2662_s12 = int_to_ptr.vmem [resolvable:$true] %s308_s12 }
  0x1a   : > { %p2670_p9 = pneg %p2647_p7 }
  0x1c   : > { %s3346_s15 = scalar_select %p2670_p9, 1, 0 }
  0x1e   : > { %s2659_s10 = scalar_lea.hbm %s3345_s1, %s2645_s29  ;;  %s2346_s25 = scalar_lea.hbm %s3345_s1, 1024 }
  0x1f   : > { %s2341_s14 = scalar_lea.hbm %s2659_s10, 512  ;;  %p2347_p12 = scmp.lt.u32.totalorder %s2659_s10, %s3345_s1 }
  0x20   : > { %p2342_p8 = scmp.ne.s32.totalorder %s2659_s10, %s2341_s14  ;;  %p2348_p13 = scmp.lt.u32.totalorder %s2346_s25, %s2341_s14 }
  0x21   : > { %p2350_p2 = scmp.lt.u32.totalorder %s2341_s14, %s2659_s10 }
  0x22   : > { %p2344_p10 = pnand %p2670_p9, %p2342_p8  ;;  %p2349_p0 = por %p2348_p13, %p2347_p12 }
  0x24   : > { %p2345_p11 = pneg %p2344_p10  ;;  %p2351_p4 = por %p2350_p2, %p2349_p0 }
  0x26   : > { %p2352_p5 = pnand %p2351_p4, %p2345_p11 }
  0x28   : > { %2355 = shalt.err (!%p2352_p5)
}
  0x29   : > { %s2356_s7 = scalar_lea.vmem %s2662_s12, 512  ;;  %s2551_s9 = smov [#allocation9]  }
  0x2a   : > { %p2357_p6 = scmp.ne.s32.totalorder %s2662_s12, %s2356_s7  ;;  %s2361_s11 = sshll.u32 %s2551_s9, 4  ;;  %s2362_s11 = int_to_ptr.vmem [resolvable:$false] %s2361_s11 }
  0x2b   : > { %s2363_s16 = scalar_lea.vmem %s2362_s11, 1024  ;;  %p2364_p3 = scmp.lt.s32.totalorder %s2662_s12, %s2362_s11 }
  0x2c   : > { %p2359_p8 = pnand %p2357_p6, %p2670_p9  ;;  %p2365_p1 = scmp.lt.s32.totalorder %s2363_s16, %s2356_s7 }
  0x2e   : > { %p2360_p10 = pneg %p2359_p8  ;;  %p2366_p12 = por %p2365_p1, %p2364_p3 }
  0x30   : > { %p2367_p13 = pnand %p2366_p12, %p2360_p10 }
  0x32   : > { %2370 = shalt.err (!%p2367_p13)
}
  0x33   : > { %s3315_s14 = smov 64   ;;  %s3317_s17 = smov 4  }
  0x34   : > { %2197 = dma.hbm_to_vmem [thread:$0]  (!%p2647_p7), %s2659_s10, 512, %s2662_s12, %s2664_s13, %s3315_s14, %s3315_s14, %s3317_s17  }
  0x35   : > { %s2698_s25 = sadd.s32 4294967295, %s2549_s23   ;;  %s1990_s26 = sadd.s32 4294967294, %s2549_s23  }
  0x36   : > { %p75_p1 = scmp.ne.s32.totalorder %s2533_s19, %s2529_s18  ;;  %p3324_p3 = scmp.eq.s32.totalorder %s2698_s25, 0 }
  0x37   : > { %p215_p11 = scmp.eq.s32.totalorder %s2698_s25, 1  ;;  %p221_p0 = scmp.eq.s32.totalorder %s1990_s26, 1 }
  0x38   : > { %p1991_p2 = scmp.ge.s32.totalorder %s2549_s23, 1  ;;  %p2708_p4 = por %p3324_p3, %p75_p1 }
  0x39   : > { %p3348_p5 = scmp.ne.s32.totalorder %s2537_s20, %s2533_s19  ;;  %p2719_p8 = por %p221_p0, %p75_p1 }
  0x3a   : > { %s3347_s8 = scalar_select %p2708_p4, 1, 0 }
  0x3b   : > { %p2715_p6 = por %p215_p11, %p3348_p5  ;;  %p228_p10 = scmp.lt.s32.totalorder %s2549_s23, 3 }
  0x3c   : > { %s3351_s12 = scalar_select %p2719_p8, 1, 0 }
  0x3d   : > { %s3349_s10 = scalar_select %p2715_p6, 1, 0 }
  0x3e   : > { %3352 = sst [smem:[#allocation25_spill]] %s3351_s12  ;;  %p2724_p12 = pnand %p1991_p2, %p228_p10 }
  0x3f   : > { %3350 = sst [smem:[#allocation24_spill]] %s3349_s10  ;;  %s2554_s9 = smov [#allocation12]  }
  0x40   : > { %s3353_s7 = scalar_select %p2724_p12, 1, 0 }
  0x41   : > { %s252_s11 = sshll.u32 %s2554_s9, 4  ;;  %p2187_p13 = pneg %p2724_p12  ;;  %s2728_s11 = int_to_ptr.vmem [resolvable:$true] %s252_s11 }
  0x42   : > { %s2742_s17 = scalar_lea.hbm %s3308_s0, %s2645_s29  ;;  %s270_s27 = scalar_lea.vmem [#allocation6], %s2642_s28 }
  0x43   : > { %p2734_p11 = pnand %p2187_p13, %p3324_p3  ;;  %s282_s1 = sshll.u32 %s270_s27, 4  ;;  %s2745_s1 = int_to_ptr.vmem [resolvable:$true] %s282_s1 }
  0x44   : > { %s2371_s22 = scalar_lea.hbm %s3312_s4, 128 }
  0x45   : > { %p2372_p1 = scmp.ne.s32.totalorder %s3312_s4, %s2371_s22  ;;  %p2373_p0 = pneg %p2734_p11 }
  0x46   : > { %p2378_p10 = scmp.lt.u32.totalorder %s2371_s22, %s3312_s4 }
  0x47   : > { %p2374_p2 = pnand %p2373_p0, %p2372_p1 }
  0x49   : > { %p2375_p5 = pneg %p2374_p2 }
  0x4b   : > { %p2380_p13 = pnand %p2378_p10, %p2375_p5 }
  0x4d   : > { %2383 = shalt.err (!%p2380_p13)
}
  0x4e   : > { %s2384_s27 = scalar_lea.vmem %s2728_s11, 128  ;;  %p2392_p4 = scmp.lt.s32.totalorder %s2728_s11, %s2728_s11 }
  0x4f   : > { %p2385_p3 = scmp.ne.s32.totalorder %s2728_s11, %s2384_s27  ;;  %p2393_p12 = scmp.lt.s32.totalorder %s2384_s27, %s2384_s27 }
  0x51   : > { %p2387_p8 = pnand %p2385_p3, %p2373_p0  ;;  %p2394_p7 = por %p2393_p12, %p2392_p4 }
  0x53   : > { %p2388_p6 = pneg %p2387_p8 }
  0x55   : > { %p2395_p9 = pnand %p2394_p7, %p2388_p6 }
  0x57   : > { %2398 = shalt.err (!%p2395_p9)
}
  0x58   : > { %s2555_s23 = smov 32   ;;  %s2556_s22 = smov 2  }
  0x59   : > { %2190 = dma.hbm_to_vmem [thread:$0]  (!%p2734_p11), %s3312_s4, 128, %s2728_s11, [#allocation13], %s2555_s23, %s2555_s23, %s2556_s22  }
  0x5a   : > { %s3355_s9 = sand.u32 1, %s2537_s20   ;;  %s2399_s26 = scalar_lea.hbm %s2742_s17, 512 }
  0x5b   : > { %s2770_s14 = scalar_lea.sflag [#allocation7], %s3355_s9  ;;  %p2400_p7 = scmp.ne.s32.totalorder %s2742_s17, %s2399_s26 }
  0x5c   : > { %p3356_p9 = scmp.ne.s32.totalorder %s3346_s15, 0  ;;  %s2404_s18 = scalar_lea.hbm %s3308_s0, 1024 }
  0x5d   : > { %p2405_p6 = scmp.lt.u32.totalorder %s2742_s17, %s3308_s0  ;;  %p2406_p8 = scmp.lt.u32.totalorder %s2404_s18, %s2399_s26 }
  0x5e   : > { %p2402_p3 = pnand %p2400_p7, %p3356_p9  ;;  %p2408_p1 = scmp.lt.u32.totalorder %s2399_s26, %s2742_s17 }
  0x5f   : > { %p2407_p12 = por %p2406_p8, %p2405_p6 }
  0x60   : > { %p2403_p4 = pneg %p2402_p3 }
  0x61   : > { %p2409_p11 = por %p2408_p1, %p2407_p12 }
  0x63   : > { %p2410_p0 = pnand %p2409_p11, %p2403_p4 }
  0x65   : > { %2413 = shalt.err (!%p2410_p0)
}
  0x66   : > { %s2414_s11 = scalar_lea.vmem %s2745_s1, 512  ;;  %s2557_s12 = smov [#allocation6]  }
  0x67   : > { %p2415_p2 = scmp.ne.s32.totalorder %s2745_s1, %s2414_s11  ;;  %s2419_s16 = sshll.u32 %s2557_s12, 4  ;;  %s2420_s16 = int_to_ptr.vmem [resolvable:$false] %s2419_s16 }
  0x68   : > { %s2421_s5 = scalar_lea.vmem %s2420_s16, 1024  ;;  %p2422_p13 = scmp.lt.s32.totalorder %s2745_s1, %s2420_s16 }
  0x69   : > { %p2417_p5 = pnand %p2415_p2, %p3356_p9  ;;  %p2423_p7 = scmp.lt.s32.totalorder %s2421_s5, %s2414_s11 }
  0x6b   : > { %p2418_p10 = pneg %p2417_p5  ;;  %p2424_p3 = por %p2423_p7, %p2422_p13 }
  0x6d   : > { %p2425_p6 = pnand %p2424_p3, %p2418_p10 }
  0x6f   : > { %2428 = shalt.err (!%p2425_p6)
}
  0x70   : > { %p3357_p4 = scmp.ne.s32.totalorder %s3343_s30, 0  ;;  %s3358_s18 = smov 4  }
  0x71   : > { %s3359_s10 = smov 64   ;;  %s2801_s24 = scalar_lea.hbm %s3310_s2, %s2645_s29 }
  0x72   : > { %2194 = dma.hbm_to_vmem [thread:$0]  (!%p3357_p4), %s2742_s17, 512, %s2745_s1, %s2770_s14, %s3359_s10, %s3359_s10, %s3358_s18  }
  0x73   : > { %s322_s6 = scalar_lea.vmem [#allocation11], %s2642_s28  ;;  %s2429_s26 = scalar_lea.hbm %s2801_s24, 512 }
  0x74   : > { %s334_s9 = sshll.u32 %s322_s6, 4  ;;  %p2430_p8 = scmp.ne.s32.totalorder %s2801_s24, %s2429_s26  ;;  %s2804_s9 = int_to_ptr.vmem [resolvable:$true] %s334_s9 }
  0x75   : > { %s2434_s17 = scalar_lea.hbm %s3310_s2, 1024  ;;  %p2435_p11 = scmp.lt.u32.totalorder %s2801_s24, %s3310_s2 }
  0x76   : > { %p2432_p12 = pnand %p2430_p8, %p3356_p9  ;;  %p2436_p0 = scmp.lt.u32.totalorder %s2434_s17, %s2429_s26 }
  0x77   : > { %p2438_p5 = scmp.lt.u32.totalorder %s2429_s26, %s2801_s24 }
  0x78   : > { %p2433_p1 = pneg %p2432_p12  ;;  %p2437_p2 = por %p2436_p0, %p2435_p11 }
  0x7a   : > { %p2439_p10 = por %p2438_p5, %p2437_p2 }
  0x7c   : > { %p2440_p13 = pnand %p2439_p10, %p2433_p1 }
  0x7e   : > { %2443 = shalt.err (!%p2440_p13)
}
  0x7f   : > { %s2444_s28 = scalar_lea.vmem %s2804_s9, 512  ;;  %s2558_s11 = smov [#allocation11]  }
  0x80   : > { %p2445_p7 = scmp.ne.s32.totalorder %s2804_s9, %s2444_s28  ;;  %s2449_s12 = sshll.u32 %s2558_s11, 4  ;;  %s2450_s12 = int_to_ptr.vmem [resolvable:$false] %s2449_s12 }
  0x81   : > { %s2451_s16 = scalar_lea.vmem %s2450_s12, 1024  ;;  %p2452_p8 = scmp.lt.s32.totalorder %s2804_s9, %s2450_s12 }
  0x82   : > { %p2447_p3 = pnand %p2445_p7, %p3356_p9  ;;  %p2453_p12 = scmp.lt.s32.totalorder %s2451_s16, %s2444_s28 }
  0x84   : > { %p2448_p6 = pneg %p2447_p3  ;;  %p2454_p11 = por %p2453_p12, %p2452_p8 }
  0x86   : > { %p2455_p0 = pnand %p2454_p11, %p2448_p6 }
  0x88   : > { %2458 = shalt.err (!%p2455_p0)
}
  0x89   : > { %2200 = dma.hbm_to_vmem [thread:$0]  (!%p3357_p4), %s2801_s24, 512, %s2804_s9, %s2664_s13, %s3359_s10, %s3359_s10, %s3358_s18  }
  0x8a   : > { %p3360_p9 = scmp.ne.s32.totalorder %s3353_s7, 0 }
  0x8b   : > { %s2834_s15 = sand.u32 (!%p3360_p9), 1, %s2533_s19   ;;  %p3361_p1 = scmp.ne.s32.totalorder (!%p3360_p9), %s3347_s8, 0 }
  0x8c   : > { %346 = sbr.rel (%p3360_p9) target bundleno = 1406 (0x57e), region = 40  ;;  %s2005_s5 = sshll.u32 (!%p3360_p9), %s2834_s15, 5 }
  0x8d   : > { %s349_s23 = scalar_lea.sflag (!%p3360_p9), [#allocation7], %s2834_s15  ;;  %s2838_s22 = scalar_lea.vmem (!%p3360_p9), [#allocation6], %s2005_s5 }
  0x93   : > { %2512 = dma.done.wait (%p3361_p1), %s349_s23, 512  }
  0x94   : > { %2514 = vsyncadd (%p3361_p1), %s349_s23, 4294966784  ;;  %s357_s30 = sand.u32 1, %s2698_s25   ;;  %s2845_s7 = scalar_lea.vmem [#allocation9], %s2005_s5 }
  0x95   : > { %s358_s13 = scalar_lea.sflag [#allocation10], %s357_s30 }
  0x96   : > { %2516 = dma.done.wait (%p3361_p1), %s358_s13, 1024  }
  0x97   : > { %2518 = vsyncadd (%p3361_p1), %s358_s13, 4294966272  ;;  %s2851_s18 = scalar_lea.vmem [#allocation11], %s2005_s5  ;;  %p3362_p4 = scmp.eq.s32.totalorder %s2698_s25, 0 }
  0x99   : > { %2520 = dma.done.wait (%p3362_p4), [#allocation13], 128   ;;  %p3363_p2 = pmov %p3362_p4 }
  0x9a   : > { %v2559_v0 = vmov 0.0   ;;  %vm2560_vm0 = vmmov 0   ;;  %vm477_vm1 = vcmask 261120   ;;  %v486_v1 = vld [vmem:[%s3311_s3] sm:$0x3]  ;;  %vm678_vm2 = vcmask 31744  }
  0x9b   : > { %2522 = vsyncadd (%p3363_p2), [#allocation13], 4294967168  ;;  %2079 = vmatprep.subr.bf16.mxu0 %v2559_v0  ;;  %2085 = vmatprep.subr.bf16.mxu1 %v2559_v0  ;;  %v487_v2 = vld [vmem:[%s3311_s3 + $0x2] sm:$0x3]  ;;  %v494_v4 = vsel %vm477_vm1, %v486_v1, 0  ;;  %vm779_vm3 = vcmask 1041408  }
  0x9c   : > { %2081 = vmatprep.mubr.msk.bf16.mxu0 %vm2560_vm0, %v2559_v0  ;;  %2087 = vmatprep.mubr.msk.bf16.mxu1 %vm2560_vm0, %v2559_v0  ;;  %v437_v3 = vld [vmem:[%s2838_s22] sm:$0xf]  ;;  %v541_v5 = vsel %vm477_vm1, %v487_v2, 0  ;;  %v438_v6 = vld [vmem:[%s2838_s22 + $0x4] sm:$0xf]  ;;  %vm727_vm4 = vcmask 7168  }
  0x9d   : > { %v445_v7 = vmul.bf16 1043676725, %v437_v3  ;;  %2080 = vmatpush3.bf16.xpose.msra.mxu0 %v494_v4  ;;  %2086 = vmatpush3.bf16.xpose.msra.mxu1 %v541_v5  ;;  %v446_v8 = vmul.bf16 1043676725, %v438_v6  ;;  %v439_v9 = vld [vmem:[%s2838_s22 + $0x8] sm:$0xf] }
  0x9e   : > { %v440_v10 = vld [vmem:[%s2838_s22 + $0xc] sm:$0xf]  ;;  %v447_v11 = vmul.bf16 1043676725, %v439_v9  ;;  %2091 = vmatprep.subr.bf16.mxu0 %v2559_v0  ;;  %v488_v13 = vld [vmem:[%s3311_s3 + $0x4] sm:$0x3]  ;;  %2097 = vmatprep.subr.bf16.mxu1 %v2559_v0 }
  0x9f   : > { %v448_v12 = vmul.bf16 1043676725, %v440_v10  ;;  %v2010_v14 = vcombine.low %v445_v7, %v446_v8  ;;  %v441_v15 = vld [vmem:[%s2838_s22 + $0x10] sm:$0xf]  ;;  %v588_v17 = vsel %vm477_vm1, %v488_v13, 0  ;;  %vm1216_vm6 = vcmask 130048  }
  0xa0   : > { %v442_v18 = vld [vmem:[%s2838_s22 + $0x14] sm:$0xf]  ;;  %v449_v19 = vmul.bf16 1043676725, %v441_v15  ;;  %v443_v21 = vld [vmem:[%s2838_s22 + $0x18] sm:$0xf] }
  0xa1   : > { %v2011_v16 = vcombine.low %v447_v11, %v448_v12  ;;  %478 = vst.msk [vmem:[#allocation2] sm:$0xff] %vm477_vm1, %v2010_v14  ;;  %v450_v20 = vmul.bf16 1043676725, %v442_v18  ;;  %v444_v22 = vld [vmem:[%s2838_s22 + $0x1c] sm:$0xf]  ;;  %s2009_s1 = sshll.u32 %s2834_s15, 6 }
  0xa2   : > { %v451_v23 = vmul.bf16 1043676725, %v443_v21  ;;  %v452_v24 = vmul.bf16 1043676725, %v444_v22  ;;  %v489_v25 = vld [vmem:[%s3311_s3 + $0x6] sm:$0x3] }
  0xa3   : > { %479 = vst.msk [vmem:[#allocation2 + $0x8] sm:$0xff] %vm477_vm1, %v2011_v16  ;;  %v2012_v26 = vcombine.low %v449_v19, %v450_v20  ;;  %v635_v29 = vsel %vm477_vm1, %v489_v25, 0  ;;  %v772_v57 = vld [vmem:[#allocation12] sm:$0x3]  ;;  %v773_v59 = vld [vmem:[#allocation12 + $0x2] sm:$0x3] }
  0xa4   : > { %v2013_v27 = vcombine.low %v451_v23, %v452_v24  ;;  %v781_v58 = vsel %vm779_vm3, %v772_v57, 0  ;;  %v828_v60 = vsel %vm779_vm3, %v773_v59, 0  ;;  %v774_v23 = vld [vmem:[#allocation12 + $0x4] sm:$0x3]  ;;  %v775_v25 = vld [vmem:[#allocation12 + $0x6] sm:$0x3] }
  0xa5   : > { %480 = vst.msk [vmem:[#allocation2 + $0x10] sm:$0xff] %vm477_vm1, %v2012_v26  ;;  %s3234_s17 = scalar_lea.vmem [#allocation14], %s2009_s1  ;;  %s3364_s14 = sld [smem:[#allocation24_spill]] }
  0xa6   : > { %481 = vst.msk [vmem:[#allocation2 + $0x18] sm:$0xff] %vm477_vm1, %v2013_v27  ;;  %s2046_s29 = sshll.u32 %s2541_s21, 10  ;;  %s1812_s28 = sshll.u32 %s3234_s17, 4  ;;  %s3257_s28 = int_to_ptr.vmem [resolvable:$true] %s1812_s28 }
  0xa7   : > { %s3365_s16 = sld [smem:[#allocation27_spill]]  ;;  %s1794_s23 = scalar_lea.sflag [#allocation8], %s2834_s15 }
  0xa8   : > { %v2892_v28 = vld [vmem:[#allocation2] sm:$0xff]  ;;  %s2459_s21 = scalar_lea.vmem %s3257_s28, 1024  ;;  %s2562_s22 = smov [#allocation14]  }
  0xa9   : > { %2082 = vmatmul.mubr.msk.bf16.vlgmr.msra.gmra.mrb[0].mxu0 %vm477_vm1, %v2892_v28  ;;  %p2460_p5 = scmp.ne.s32.totalorder %s3257_s28, %s2459_s21  ;;  %s2463_s30 = sshll.u32 %s2562_s22, 4  ;;  %s2464_s30 = int_to_ptr.vmem [resolvable:$false] %s2463_s30 }
  0xaa   : > { %v2897_v30 = vld [vmem:[#allocation2 + $0x8] sm:$0xff]  ;;  %2092 = vmatpush3.bf16.xpose.msra.mxu0 %v588_v17  ;;  %2093 = vmatprep.mubr.msk.bf16.mxu0 %vm2560_vm0, %v2559_v0  ;;  %s2465_s13 = scalar_lea.vmem %s2464_s30, 2048  ;;  %p2466_p3 = scmp.lt.s32.totalorder %s3257_s28, %s2464_s30 }
  0xab   : > { %2088 = vmatmul.mubr.msk.bf16.vlgmr.msra.gmra.mrb[0].mxu1 %vm477_vm1, %v2897_v30  ;;  %2103 = vmatprep.subr.bf16.mxu0 %v2559_v0  ;;  %p3366_p10 = scmp.ne.s32.totalorder %s3364_s14, 0  ;;  %p2467_p6 = scmp.lt.s32.totalorder %s2465_s13, %s2459_s21 }
  0xac   : > { %2098 = vmatpush3.bf16.xpose.msra.mxu1 %v635_v29  ;;  %2099 = vmatprep.mubr.msk.bf16.mxu1 %vm2560_vm0, %v2559_v0  ;;  %v2907_v31 = vld [vmem:[#allocation2 + $0x10] sm:$0xff] }
  0xad   : > { %2109 = vmatprep.subr.bf16.mxu1 %v2559_v0  ;;  %v2909_v32 = vld [vmem:[#allocation2 + $0x18] sm:$0xff]  ;;  %s3255_s5 = scalar_lea.hbm %s3365_s16, %s2046_s29  ;;  %p2461_p13 = pnand %p2460_p5, %p3366_p10 }
  0xae   : > { %p2468_p8 = por %p2467_p6, %p2466_p3 }
  0xaf   : > { %p2462_p7 = pneg %p2461_p13 }
  0xb1   : > { %2094 = vmatmul.mubr.msk.bf16.vlgmr.msra.gmra.mrb[4].mxu0 %vm477_vm1, %v2907_v31  ;;  %p2469_p12 = pnand %p2468_p8, %p2462_p7 }
  0xb2   : > { %2105 = vmatprep.mubr.msk.bf16.mxu0 %vm2560_vm0, %v2559_v0  ;;  %2104 = vmatpush3.bf16.msra.mxu0 %v781_v58 }
  0xb3   : > { %2100 = vmatmul.mubr.msk.bf16.vlgmr.msra.gmra.mrb[4].mxu1 %vm477_vm1, %v2909_v32  ;;  %2115 = vmatprep.subr.bf16.mxu0 %v2559_v0 }
  0xb4   : > { %2111 = vmatprep.mubr.msk.bf16.mxu1 %vm2560_vm0, %v2559_v0  ;;  %2110 = vmatpush3.bf16.msra.mxu1 %v828_v60 }
  0xb5   : > { %2121 = vmatprep.subr.bf16.mxu1 %v2559_v0 }
 0x17c   : > { %v530_v33 = vpop.f32.mrb[0].mxu0 }
 0x17d   : > { %v2083_v35 = vpop.f32.mrb[1].mxu0  ;;  %v679_v36 = vsel %vm678_vm2, %v530_v33, -inf }
 0x17e   : > { %v577_v34 = vpop.f32.mrb[0].mxu1  ;;  %680 = vmax.xlane.f32.xlu0 %v679_v36  ;;  %v533_v39 = vpop.f32.mrb[2].mxu0  ;;  %v922_v35 = vsel %vm779_vm3, %v775_v25, 0 }
 0x17f   : > { %v685_v37 = vsel %vm678_vm2, %v577_v34, -inf  ;;  %v2089_v38 = vpop.f32.mrb[1].mxu1  ;;  %v2084_v40 = vpop.f32.mrb[3].mxu0  ;;  %v682_v44 = vsel %vm678_vm2, %v533_v39, -inf }
 0x180   : > { %686 = vmax.xlane.f32.xlu1 %v685_v37  ;;  %v580_v41 = vpop.f32.mrb[2].mxu1  ;;  %v2269_v38 = vld [vmem:[%s2845_s7] sm:$0xff]   ;;  %v2270_v40 = vld [vmem:[%s2845_s7 + $0x8] sm:$0xff]  }
 0x181   : > { %v2090_v42 = vpop.f32.mrb[3].mxu1  ;;  %v688_v43 = vsel %vm678_vm2, %v580_v41, -inf }
 0x182   : > { %683 = vmax.xlane.f32.xlu0 %v682_v44 }
 0x184   : > { %689 = vmax.xlane.f32.xlu1 %v688_v43  ;;  %v624_v45 = vpop.f32.mrb[4].mxu0  ;;  %v995_v43 = vsel %vm477_vm1, %v2269_v38, 0 }
 0x185   : > { %v2095_v46 = vpop.f32.mrb[5].mxu0  ;;  %v691_v47 = vsel %vm678_vm2, %v624_v45, -inf }
 0x186   : > { %v671_v48 = vpop.f32.mrb[4].mxu1  ;;  %692 = vmax.xlane.f32.xlu0 %v691_v47  ;;  %v627_v49 = vpop.f32.mrb[6].mxu0  ;;  %v2271_v46 = vld [vmem:[%s2845_s7 + $0x10] sm:$0xff]   ;;  %v2272_v47 = vld [vmem:[%s2845_s7 + $0x18] sm:$0xff]  }
 0x187   : > { %v2101_v50 = vpop.f32.mrb[5].mxu1  ;;  %v2096_v51 = vpop.f32.mrb[7].mxu0  ;;  %v694_v52 = vsel %vm678_vm2, %v627_v49, -inf  ;;  %v697_v54 = vsel %vm678_vm2, %v671_v48, -inf }
 0x188   : > { %v674_v53 = vpop.f32.mrb[6].mxu1  ;;  %695 = vmax.xlane.f32.xlu1 %v694_v52 }
 0x189   : > { %v2102_v55 = vpop.f32.mrb[7].mxu1  ;;  %v700_v56 = vsel %vm678_vm2, %v674_v53, -inf }
 0x18a   : > { %698 = vmax.xlane.f32.xlu0 %v697_v54  ;;  %v1194_v54 = vlaneseq }
 0x18c   : > { %701 = vmax.xlane.f32.xlu1 %v700_v56 }
 0x20b   : > { %v681_v61 = vpop.xlane.xlu0 %680 }
 0x20c   : > { %v703_v63 = vsub.f32 %v530_v33, %v681_v61  ;;  %728 = vst.msk [vmem:[#allocation3] sm:$0xff] %vm727_vm4, %v681_v61  ;;  %v875_v33 = vsel %vm779_vm3, %v774_v23, 0  ;;  %v1195_v61 = vand.u32 127, %v1194_v54 }
 0x20d   : > { %v687_v62 = vpop.xlane.xlu1 %686 }
 0x20e   : > { %v705_v1 = vsub.f32 %v577_v34, %v687_v62  ;;  %730 = vst.msk [vmem:[#allocation3 + $0x10] sm:$0xff] %vm727_vm4, %v687_v62  ;;  %v711_v2 = vmul.f32 1.442695, %v703_v63  ;;  %vm1199_vm5 = vcmp.lt.s32.totalorder %v1195_v61, 8 }
 0x20f   : > { %v684_v4 = vpop.xlane.xlu0 %683 }
 0x210   : > { %v715_v3 = vmul.f32 1.442695, %v705_v1  ;;  %v704_v6 = vsub.f32 %v533_v39, %v684_v4  ;;  %729 = vst.msk [vmem:[#allocation3 + $0x8] sm:$0xff] %vm727_vm4, %v684_v4  ;;  %2277 = vpow2.f32 %v711_v2 }
 0x211   : > { %v690_v5 = vpop.xlane.xlu1 %689 }
 0x212   : > { %v706_v7 = vsub.f32 %v580_v41, %v690_v5  ;;  %731 = vst.msk [vmem:[#allocation3 + $0x18] sm:$0xff] %vm727_vm4, %v690_v5  ;;  %v713_v8 = vmul.f32 1.442695, %v704_v6  ;;  %2279 = vpow2.f32 %v715_v3 }
 0x213   : > { %v693_v10 = vpop.xlane.xlu0 %692 }
 0x214   : > { %v717_v9 = vmul.f32 1.442695, %v706_v7  ;;  %2281 = vpow2.f32 %v713_v8  ;;  %v707_v11 = vsub.f32 %v624_v45, %v693_v10  ;;  %732 = vst.msk [vmem:[#allocation3 + $0x20] sm:$0xff] %vm727_vm4, %v693_v10  ;;  %v1047_v45 = vsel %vm477_vm1, %v2270_v40, 0 }
 0x215   : > { %v696_v12 = vpop.xlane.xlu1 %695 }
 0x216   : > { %2283 = vpow2.f32 %v717_v9  ;;  %v719_v13 = vmul.f32 1.442695, %v707_v11  ;;  %v708_v14 = vsub.f32 %v627_v49, %v696_v12  ;;  %733 = vst.msk [vmem:[#allocation3 + $0x28] sm:$0xff] %vm727_vm4, %v696_v12  ;;  %v1151_v49 = vsel %vm477_vm1, %v2272_v47, 0 }
 0x217   : > { %v699_v15 = vpop.xlane.xlu0 %698 }
 0x218   : > { %v721_v16 = vmul.f32 1.442695, %v708_v14  ;;  %v709_v17 = vsub.f32 %v671_v48, %v699_v15  ;;  %734 = vst.msk [vmem:[#allocation3 + $0x30] sm:$0xff] %vm727_vm4, %v699_v15  ;;  %2285 = vpow2.f32 %v719_v13  ;;  %v1099_v48 = vsel %vm477_vm1, %v2271_v46, 0  ;;  %v3055_v46 = vld [vmem:[#allocation3] sm:$0xff] }
 0x219   : > { %v702_v18 = vpop.xlane.xlu1 %701 }
 0x21a   : > { %2287 = vpow2.f32 %v721_v16  ;;  %v723_v19 = vmul.f32 1.442695, %v709_v17  ;;  %v710_v20 = vsub.f32 %v674_v53, %v702_v18  ;;  %735 = vst.msk [vmem:[#allocation3 + $0x38] sm:$0xff] %vm727_vm4, %v702_v18  ;;  %v2939_v21 = vpop.eup %2277 }
 0x21c   : > { %v725_v22 = vmul.f32 1.442695, %v710_v20  ;;  %v2941_v24 = vpop.eup %2279  ;;  %2289 = vpow2.f32 %v723_v19 }
 0x21d   : > { %v3098_v61 = vld [vmem:[#allocation3 + $0x28] sm:$0xff] }
 0x21e   : > { %v2943_v26 = vpop.eup %2281  ;;  %2291 = vpow2.f32 %v725_v22 }
 0x21f   : > { %v768_v29 = vpack.c.bf16 %v2943_v26, %v2939_v21 }
 0x220   : > { %v2945_v27 = vpop.eup %2283 }
 0x221   : > { %v769_v34 = vpack.c.bf16 %v2945_v27, %v2941_v24  ;;  %2106 = vmatmul.mubr.msk.bf16.vlgmr.msra.gmra.mrb[8].mxu0 %vm678_vm2, %v768_v29 }
 0x222   : > { %2116 = vmatpush3.bf16.msra.mxu0 %v875_v33  ;;  %v2955_v36 = vpop.eup %2285  ;;  %2117 = vmatprep.mubr.msk.bf16.mxu0 %vm2560_vm0, %v2559_v0 }
 0x223   : > { %2112 = vmatmul.mubr.msk.bf16.vlgmr.msra.gmra.mrb[8].mxu1 %vm678_vm2, %v769_v34  ;;  %2127 = vmatprep.subr.bf16.mxu0 %v2559_v0 }
 0x224   : > { %2122 = vmatpush3.bf16.msra.mxu1 %v922_v35  ;;  %v2959_v37 = vpop.eup %2287  ;;  %2123 = vmatprep.mubr.msk.bf16.mxu1 %vm2560_vm0, %v2559_v0 }
 0x225   : > { %v770_v39 = vpack.c.bf16 %v2959_v37, %v2955_v36  ;;  %2133 = vmatprep.subr.bf16.mxu1 %v2559_v0 }
 0x226   : > { %v2969_v41 = vpop.eup %2289 }
 0x228   : > { %v2971_v42 = vpop.eup %2291 }
 0x229   : > { %2118 = vmatmul.mubr.msk.bf16.vlgmr.msra.gmra.mrb[12].mxu0 %vm678_vm2, %v770_v39  ;;  %v771_v44 = vpack.c.bf16 %v2971_v42, %v2969_v41 }
 0x22a   : > { %2129 = vmatprep.mubr.msk.bf16.mxu0 %vm2560_vm0, %v2559_v0 }
 0x22b   : > { %2128 = vmatpush3.bf16.xpose.msra.mxu0 %v995_v43  ;;  %2124 = vmatmul.mubr.msk.bf16.vlgmr.msra.gmra.mrb[12].mxu1 %vm678_vm2, %v771_v44 }
 0x22c   : > { %2139 = vmatprep.subr.bf16.mxu0 %v2559_v0  ;;  %2135 = vmatprep.mubr.msk.bf16.mxu1 %vm2560_vm0, %v2559_v0 }
 0x22d   : > { %2134 = vmatpush3.bf16.xpose.msra.mxu1 %v1047_v45  ;;  %v2561_v45 = vmov 0  }
 0x22e   : > { %2145 = vmatprep.subr.bf16.mxu1 %v2559_v0  ;;  %2267 = vset.pattern.permute.xlu0 %v2561_v45 }
 0x22f   : > { %2268 = vset.pattern.permute.xlu1 %v2561_v45 }
 0x232   : > { %2130 = vmatmul.mubr.msk.bf16.vlgmr.msra.gmra.mrb[16].mxu0 %vm477_vm1, %v2892_v28 }
 0x233   : > { %2140 = vmatpush3.bf16.xpose.msra.mxu0 %v1099_v48  ;;  %2141 = vmatprep.mubr.msk.bf16.mxu0 %vm2560_vm0, %v2559_v0 }
 0x234   : > { %2136 = vmatmul.mubr.msk.bf16.vlgmr.msra.gmra.mrb[16].mxu1 %vm477_vm1, %v2897_v30  ;;  %2151 = vmatprep.subr.bf16.mxu0 %v2559_v0 }
 0x235   : > { %2146 = vmatpush3.bf16.xpose.msra.mxu1 %v1151_v49  ;;  %2147 = vmatprep.mubr.msk.bf16.mxu1 %vm2560_vm0, %v2559_v0  ;;  %v3060_v49 = vld [vmem:[#allocation3 + $0x8] sm:$0xff] }
 0x236   : > { %2157 = vmatprep.subr.bf16.mxu1 %v2559_v0 }
 0x23a   : > { %2142 = vmatmul.mubr.msk.bf16.vlgmr.msra.gmra.mrb[20].mxu0 %vm477_vm1, %v2907_v31 }
 0x23b   : > { %2153 = vmatprep.mubr.msk.bf16.mxu0 %vm2560_vm0, %v2559_v0 }
 0x23c   : > { %2148 = vmatmul.mubr.msk.bf16.vlgmr.msra.gmra.mrb[20].mxu1 %vm477_vm1, %v2909_v32 }
 0x23d   : > { %2159 = vmatprep.mubr.msk.bf16.mxu1 %vm2560_vm0, %v2559_v0 }
 0x2f4   : > { %v817_v28 = vpop.f32.mrb[8].mxu0 }
 0x2f5   : > { %965 = vst.msk [vmem:[#allocation5] sm:$0xff] %vm477_vm1, %v817_v28  ;;  %v2107_v50 = vpop.f32.mrb[9].mxu0 }
 0x2f6   : > { %v864_v30 = vpop.f32.mrb[8].mxu1  ;;  %v820_v52 = vpop.f32.mrb[10].mxu0 }
 0x2f7   : > { %967 = vst.msk [vmem:[#allocation5 + $0x10] sm:$0xff] %vm477_vm1, %v864_v30  ;;  %v2113_v51 = vpop.f32.mrb[9].mxu1  ;;  %966 = vst.msk [vmem:[#allocation5 + $0x8] sm:$0xff] %vm477_vm1, %v820_v52  ;;  %v2108_v53 = vpop.f32.mrb[11].mxu0 }
 0x2f8   : > { %v867_v31 = vpop.f32.mrb[10].mxu1  ;;  %v3070_v51 = vld [vmem:[#allocation3 + $0x10] sm:$0xff] }
 0x2f9   : > { %968 = vst.msk [vmem:[#allocation5 + $0x18] sm:$0xff] %vm477_vm1, %v867_v31  ;;  %v2114_v32 = vpop.f32.mrb[11].mxu1 }
 0x2fa   : > { %v3079_v32 = vld [vmem:[#allocation3 + $0x18] sm:$0xff] }
 0x2fc   : > { %v911_v55 = vpop.f32.mrb[12].mxu0 }
 0x2fd   : > { %969 = vst.msk [vmem:[#allocation5 + $0x20] sm:$0xff] %vm477_vm1, %v911_v55  ;;  %v2119_v56 = vpop.f32.mrb[13].mxu0 }
 0x2fe   : > { %v914_v57 = vpop.f32.mrb[14].mxu0  ;;  %v958_v58 = vpop.f32.mrb[12].mxu1 }
 0x2ff   : > { %970 = vst.msk [vmem:[#allocation5 + $0x28] sm:$0xff] %vm477_vm1, %v914_v57  ;;  %971 = vst.msk [vmem:[#allocation5 + $0x30] sm:$0xff] %vm477_vm1, %v958_v58  ;;  %v2120_v59 = vpop.f32.mrb[15].mxu0  ;;  %v2125_v60 = vpop.f32.mrb[13].mxu1  ;;  %v3089_v57 = vld [vmem:[#allocation3 + $0x20] sm:$0xff] }
 0x300   : > { %v961_v62 = vpop.f32.mrb[14].mxu1 }
 0x301   : > { %972 = vst.msk [vmem:[#allocation5 + $0x38] sm:$0xff] %vm477_vm1, %v961_v62  ;;  %v2126_v63 = vpop.f32.mrb[15].mxu1 }
 0x305   : > { %v1031_v1 = vpop.f32.mrb[16].mxu0 }
 0x306   : > { %v3016_v2 = vsel %vm1199_vm5, %v1031_v1, -1e+30  ;;  %v2131_v3 = vpop.f32.mrb[17].mxu0 }
 0x307   : > { %v1083_v4 = vpop.f32.mrb[16].mxu1  ;;  %v1034_v5 = vpop.f32.mrb[18].mxu0  ;;  %v1217_v8 = vsel %vm1216_vm6, %v3016_v2, -inf  ;;  %v3108_v3 = vld [vmem:[#allocation3 + $0x30] sm:$0xff] }
 0x308   : > { %v3019_v6 = vsel %vm1199_vm5, %v1083_v4, -1e+30  ;;  %v2137_v7 = vpop.f32.mrb[17].mxu1  ;;  %v3024_v9 = vsel %vm1199_vm5, %v1034_v5, -1e+30  ;;  %1218 = vmax.xlane.f32.xlu0 %v1217_v8  ;;  %v2132_v10 = vpop.f32.mrb[19].mxu0 }
 0x309   : > { %v1086_v11 = vpop.f32.mrb[18].mxu1  ;;  %v1220_v13 = vsel %vm1216_vm6, %v3024_v9, -inf  ;;  %v1223_v14 = vsel %vm1216_vm6, %v3019_v6, -inf  ;;  %v3117_v8 = vld [vmem:[#allocation3 + $0x38] sm:$0xff] }
 0x30a   : > { %v2138_v12 = vpop.f32.mrb[19].mxu1  ;;  %v3031_v15 = vsel %vm1199_vm5, %v1086_v11, -1e+30  ;;  %1221 = vmax.xlane.f32.xlu1 %v1220_v13 }
 0x30b   : > { %v1226_v17 = vsel %vm1216_vm6, %v3031_v15, -inf }
 0x30c   : > { %1224 = vmax.xlane.f32.xlu0 %v1223_v14  ;;  %v2273_v14 = vld [vmem:[%s2851_s18] sm:$0xff]  }
 0x30d   : > { %v1135_v16 = vpop.f32.mrb[20].mxu0  ;;  %2152 = vmatpush3.bf16.msra.mxu0 %v2273_v14 }
 0x30e   : > { %v3036_v18 = vsel %vm1199_vm5, %v1135_v16, -1e+30  ;;  %1227 = vmax.xlane.f32.xlu1 %v1226_v17  ;;  %v2143_v19 = vpop.f32.mrb[21].mxu0  ;;  %2163 = vmatprep.subr.bf16.mxu0 %v2559_v0  ;;  %v2274_v16 = vld [vmem:[%s2851_s18 + $0x8] sm:$0xff]   ;;  %v739_v17 = vsel %vm678_vm2, %v2943_v26, 0.0  ;;  %v745_v26 = vsel %vm678_vm2, %v2945_v27, 0.0 }
 0x30f   : > { %v1187_v20 = vpop.f32.mrb[20].mxu1  ;;  %v1138_v22 = vpop.f32.mrb[22].mxu0  ;;  %v1229_v23 = vsel %vm1216_vm6, %v3036_v18, -inf  ;;  %2158 = vmatpush3.bf16.msra.mxu1 %v2274_v16  ;;  %v742_v19 = vsel %vm678_vm2, %v2941_v24, 0.0  ;;  %v751_v24 = vsel %vm678_vm2, %v2959_v37, 0.0 }
 0x310   : > { %v3041_v25 = vsel %vm1199_vm5, %v1187_v20, -1e+30  ;;  %v2149_v29 = vpop.f32.mrb[21].mxu1  ;;  %v3044_v33 = vsel %vm1199_vm5, %v1138_v22, -1e+30  ;;  %1230 = vmax.xlane.f32.xlu0 %v1229_v23  ;;  %v2144_v35 = vpop.f32.mrb[23].mxu0  ;;  %2169 = vmatprep.subr.bf16.mxu1 %v2559_v0 }
 0x311   : > { %v1190_v34 = vpop.f32.mrb[22].mxu1  ;;  %v1232_v38 = vsel %vm1216_vm6, %v3044_v33, -inf  ;;  %v1235_v40 = vsel %vm1216_vm6, %v3041_v25, -inf  ;;  %v748_v20 = vsel %vm678_vm2, %v2955_v36, 0.0  ;;  %v754_v22 = vsel %vm678_vm2, %v2969_v41, 0.0 }
 0x312   : > { %v3049_v39 = vsel %vm1199_vm5, %v1190_v34, -1e+30  ;;  %v2150_v43 = vpop.f32.mrb[23].mxu1  ;;  %1233 = vmax.xlane.f32.xlu1 %v1232_v38  ;;  %v736_v23 = vsel %vm678_vm2, %v2939_v21, 0.0  ;;  %v757_v36 = vsel %vm678_vm2, %v2971_v42, 0.0 }
 0x313   : > { %v1238_v44 = vsel %vm1216_vm6, %v3049_v39, -inf }
 0x314   : > { %1236 = vmax.xlane.f32.xlu0 %v1235_v40 }
 0x316   : > { %1239 = vmax.xlane.f32.xlu1 %v1238_v44 }
 0x395   : > { %v1219_v47 = vpop.xlane.xlu0 %1218 }
 0x396   : > { %v3058_v48 = vmax.f32 %v3055_v46, %v1219_v47 }
 0x397   : > { %v1222_v28 = vpop.xlane.xlu1 %1221 }
 0x398   : > { %v1249_v30 = vsub.f32 %v3055_v46, %v3058_v48  ;;  %1678 = vst.msk [vmem:[#allocation3] sm:$0xff] %vm727_vm4, %v3058_v48  ;;  %v3067_v50 = vmax.f32 %v3060_v49, %v1222_v28  ;;  %1275 = vperm.xlu0 %2267, %v3058_v48  }
 0x399   : > { %v1225_v52 = vpop.xlane.xlu0 %1224 }
 0x39a   : > { %v1250_v31 = vsub.f32 %v3060_v49, %v3067_v50  ;;  %1679 = vst.msk [vmem:[#allocation3 + $0x8] sm:$0xff] %vm727_vm4, %v3067_v50  ;;  %v3077_v53 = vmax.f32 %v3070_v51, %v1225_v52 }
 0x39b   : > { %v1228_v54 = vpop.xlane.xlu1 %1227 }
 0x39c   : > { %v1251_v55 = vsub.f32 %v3070_v51, %v3077_v53  ;;  %1680 = vst.msk [vmem:[#allocation3 + $0x10] sm:$0xff] %vm727_vm4, %v3077_v53  ;;  %v3086_v56 = vmax.f32 %v3079_v32, %v1228_v54  ;;  %1285 = vperm.xlu1 %2268, %v3077_v53  }
 0x39d   : > { %v1231_v58 = vpop.xlane.xlu0 %1230 }
 0x39e   : > { %v1252_v59 = vsub.f32 %v3079_v32, %v3086_v56  ;;  %1681 = vst.msk [vmem:[#allocation3 + $0x18] sm:$0xff] %vm727_vm4, %v3086_v56  ;;  %v3096_v60 = vmax.f32 %v3089_v57, %v1231_v58  ;;  %v1261_v48 = vmul.f32 1.442695, %v1251_v55 }
 0x39f   : > { %v1234_v62 = vpop.xlane.xlu1 %1233 }
 0x3a0   : > { %v1253_v63 = vsub.f32 %v3089_v57, %v3096_v60  ;;  %1682 = vst.msk [vmem:[#allocation3 + $0x20] sm:$0xff] %vm727_vm4, %v3096_v60  ;;  %v3105_v1 = vmax.f32 %v3098_v61, %v1234_v62  ;;  %1280 = vperm.xlu1 %2268, %v3067_v50  }
 0x3a1   : > { %v1237_v4 = vpop.xlane.xlu0 %1236 }
 0x3a2   : > { %v1254_v5 = vsub.f32 %v3098_v61, %v3105_v1  ;;  %1683 = vst.msk [vmem:[#allocation3 + $0x28] sm:$0xff] %vm727_vm4, %v3105_v1  ;;  %v3115_v7 = vmax.f32 %v3108_v3, %v1237_v4  ;;  %v2275_v4 = vld [vmem:[%s2851_s18 + $0x10] sm:$0xff]   ;;  %v1265_v50 = vmul.f32 1.442695, %v1253_v63 }
 0x3a3   : > { %v1240_v10 = vpop.xlane.xlu1 %1239 }
 0x3a4   : > { %v1255_v11 = vsub.f32 %v3108_v3, %v3115_v7  ;;  %1684 = vst.msk [vmem:[#allocation3 + $0x30] sm:$0xff] %vm727_vm4, %v3115_v7  ;;  %v3124_v12 = vmax.f32 %v3117_v8, %v1240_v10  ;;  %1290 = vperm.xlu1 %2268, %v3086_v56  }
 0x3a6   : > { %v1256_v13 = vsub.f32 %v3117_v8, %v3124_v12  ;;  %1685 = vst.msk [vmem:[#allocation3 + $0x38] sm:$0xff] %vm727_vm4, %v3124_v12  ;;  %v1269_v32 = vmul.f32 1.442695, %v1255_v11 }
 0x3a8   : > { %1295 = vperm.xlu1 %2268, %v3096_v60  }
 0x3ac   : > { %1305 = vperm.xlu1 %2268, %v3115_v7  }
 0x3b0   : > { %1300 = vperm.xlu1 %2268, %v3105_v1  }
 0x3b4   : > { %1310 = vperm.xlu1 %2268, %v3124_v12  }
 0x3b7   : > { %740 = vadd.xlane.f32.xlu0 %v739_v17 }
 0x3bb   : > { %743 = vadd.xlane.f32.xlu0 %v742_v19 }
 0x3bf   : > { %749 = vadd.xlane.f32.xlu0 %v748_v20 }
 0x3c3   : > { %755 = vadd.xlane.f32.xlu0 %v754_v22 }
 0x3d8   : > { %737 = vadd.xlane.f32.xlu1 %v736_v23 }
 0x3dc   : > { %746 = vadd.xlane.f32.xlu1 %v745_v26 }
 0x3e0   : > { %752 = vadd.xlane.f32.xlu1 %v751_v24 }
 0x3e4   : > { %758 = vadd.xlane.f32.xlu1 %v757_v36 }
 0x417   : > { %v1276_v29 = vpop.permute.xlu0 %1275 }
 0x418   : > { %v1313_v41 = vsub.f32 %v3016_v2, %v1276_v29 }
 0x41a   : > { %v1321_v34 = vmul.f32 1.442695, %v1313_v41 }
 0x41b   : > { %v1286_v35 = vpop.permute.xlu1 %1285 }
 0x41c   : > { %2293 = vpow2.f32 %v1321_v34  ;;  %v1315_v21 = vsub.f32 %v3019_v6, %v1286_v35 }
 0x41e   : > { %v1325_v38 = vmul.f32 1.442695, %v1315_v21 }
 0x41f   : > { %v1281_v40 = vpop.permute.xlu1 %1280 }
 0x420   : > { %2295 = vpow2.f32 %v1325_v38  ;;  %v1314_v27 = vsub.f32 %v3024_v9, %v1281_v40 }
 0x422   : > { %v1323_v43 = vmul.f32 1.442695, %v1314_v27 }
 0x423   : > { %v1291_v37 = vpop.permute.xlu1 %1290 }
 0x424   : > { %2297 = vpow2.f32 %v1323_v43  ;;  %v1316_v44 = vsub.f32 %v3031_v15, %v1291_v37  ;;  %v1259_v43 = vmul.f32 1.442695, %v1250_v31  ;;  %v1263_v37 = vmul.f32 1.442695, %v1252_v59 }
 0x425   : > { %v1271_v31 = vmul.f32 1.442695, %v1256_v13 }
 0x426   : > { %v2294_v42 = vpop.eup %2293  ;;  %v1327_v45 = vmul.f32 1.442695, %v1316_v44 }
 0x427   : > { %v1296_v47 = vpop.permute.xlu1 %1295  ;;  %v1353_v2 = vsel %vm1216_vm6, %v2294_v42, 0.0 }
 0x428   : > { %2299 = vpow2.f32 %v1327_v45  ;;  %v1317_v28 = vsub.f32 %v3036_v18, %v1296_v47  ;;  %1354 = vadd.xlane.f32.xlu0 %v1353_v2 }
 0x42a   : > { %v2296_v6 = vpop.eup %2295  ;;  %v1329_v52 = vmul.f32 1.442695, %v1317_v28 }
 0x42b   : > { %v1306_v54 = vpop.permute.xlu1 %1305  ;;  %v1359_v9 = vsel %vm1216_vm6, %v2296_v6, 0.0 }
 0x42c   : > { %2301 = vpow2.f32 %v1329_v52  ;;  %v1319_v58 = vsub.f32 %v3041_v25, %v1306_v54  ;;  %1360 = vadd.xlane.f32.xlu0 %v1359_v9  ;;  %v2276_v25 = vld [vmem:[%s2851_s18 + $0x18] sm:$0xff]  }
 0x42e   : > { %v2298_v15 = vpop.eup %2297  ;;  %v1333_v62 = vmul.f32 1.442695, %v1319_v58 }
 0x42f   : > { %v1301_v10 = vpop.permute.xlu1 %1300  ;;  %v1356_v14 = vsel %vm1216_vm6, %v2298_v15, 0.0  ;;  %v1450_v16 = vpack.c.bf16 %v2298_v15, %v2294_v42 }
 0x430   : > { %2303 = vpow2.f32 %v1333_v62  ;;  %v1318_v18 = vsub.f32 %v3044_v33, %v1301_v10  ;;  %1357 = vadd.xlane.f32.xlu1 %v1356_v14 }
 0x431   : > { %2154 = vmatmul.mubr.msk.bf16.vlgmr.msra.gmra.mrb[24].mxu0 %vm1216_vm6, %v1450_v16 }
 0x432   : > { %v2300_v17 = vpop.eup %2299  ;;  %v1331_v19 = vmul.f32 1.442695, %v1318_v18  ;;  %2164 = vmatpush3.bf16.msra.mxu0 %v2275_v4  ;;  %2165 = vmatprep.mubr.msk.bf16.mxu0 %vm2560_vm0, %v2559_v0 }
 0x433   : > { %v1311_v20 = vpop.permute.xlu1 %1310  ;;  %v1362_v22 = vsel %vm1216_vm6, %v2300_v17, 0.0  ;;  %v1451_v23 = vpack.c.bf16 %v2300_v17, %v2296_v6 }
 0x434   : > { %2305 = vpow2.f32 %v1331_v19  ;;  %v1320_v26 = vsub.f32 %v3049_v39, %v1311_v20  ;;  %1363 = vadd.xlane.f32.xlu1 %v1362_v22 }
 0x435   : > { %2160 = vmatmul.mubr.msk.bf16.vlgmr.msra.gmra.mrb[24].mxu1 %vm1216_vm6, %v1451_v23 }
 0x436   : > { %v2302_v33 = vpop.eup %2301  ;;  %v1335_v24 = vmul.f32 1.442695, %v1320_v26  ;;  %2170 = vmatpush3.bf16.msra.mxu1 %v2276_v25  ;;  %2171 = vmatprep.mubr.msk.bf16.mxu1 %vm2560_vm0, %v2559_v0  ;;  %v1257_v0 = vmul.f32 1.442695, %v1249_v30  ;;  %v1267_v30 = vmul.f32 1.442695, %v1254_v5 }
 0x437   : > { %v1365_v36 = vsel %vm1216_vm6, %v2302_v33, 0.0 }
 0x438   : > { %2307 = vpow2.f32 %v1335_v24  ;;  %1366 = vadd.xlane.f32.xlu0 %v1365_v36 }
 0x439   : > { %2309 = vpow2.f32 %v1257_v0 }
 0x43a   : > { %v2304_v29 = vpop.eup %2303  ;;  %2311 = vpow2.f32 %v1259_v43 }
 0x43b   : > { %v1371_v41 = vsel %vm1216_vm6, %v2304_v29, 0.0  ;;  %2313 = vpow2.f32 %v1263_v37 }
 0x43c   : > { %1372 = vadd.xlane.f32.xlu0 %v1371_v41  ;;  %2315 = vpow2.f32 %v1261_v48 }
 0x43d   : > { %2317 = vpow2.f32 %v1267_v30 }
 0x43e   : > { %v2306_v34 = vpop.eup %2305  ;;  %2319 = vpow2.f32 %v1265_v50 }
 0x43f   : > { %v1368_v39 = vsel %vm1216_vm6, %v2306_v34, 0.0  ;;  %v1452_v35 = vpack.c.bf16 %v2306_v34, %v2302_v33  ;;  %2321 = vpow2.f32 %v1271_v31 }
 0x440   : > { %1369 = vadd.xlane.f32.xlu1 %v1368_v39  ;;  %2323 = vpow2.f32 %v1269_v32 }
 0x441   : > { %2166 = vmatmul.mubr.msk.bf16.vlgmr.msra.gmra.mrb[28].mxu0 %vm1216_vm6, %v1452_v35 }
 0x442   : > { %v2308_v21 = vpop.eup %2307 }
 0x443   : > { %v1374_v38 = vsel %vm1216_vm6, %v2308_v21, 0.0  ;;  %v1453_v40 = vpack.c.bf16 %v2308_v21, %v2304_v29  ;;  %v2310_v53 = vpop.eup %2309 }
 0x444   : > { %v741_v27 = vpop.xlane.xlu0 %740  ;;  %1375 = vadd.xlane.f32.xlu1 %v1374_v38  ;;  %v2312_v55 = vpop.eup %2311 }
 0x445   : > { %761 = vst.msk [vmem:[#allocation4 + $0x8] sm:$0xff] %vm727_vm4, %v741_v27  ;;  %2172 = vmatmul.mubr.msk.bf16.vlgmr.msra.gmra.mrb[28].mxu1 %vm1216_vm6, %v1453_v40  ;;  %v2314_v56 = vpop.eup %2313 }
 0x446   : > { %v2316_v57 = vpop.eup %2315 }
 0x447   : > { %v2318_v59 = vpop.eup %2317 }
 0x448   : > { %v744_v46 = vpop.xlane.xlu0 %743  ;;  %v2320_v60 = vpop.eup %2319 }
 0x449   : > { %762 = vst.msk [vmem:[#allocation4 + $0x10] sm:$0xff] %vm727_vm4, %v744_v46  ;;  %v3209_v61 = vpop.eup %2321 }
 0x44a   : > { %v2324_v63 = vpop.eup %2323 }
 0x44c   : > { %v750_v49 = vpop.xlane.xlu0 %749  ;;  %v1338_v47 = vld [vmem:[#allocation4 + $0x8] sm:$0xff] }
 0x44d   : > { %764 = vst.msk [vmem:[#allocation4 + $0x20] sm:$0xff] %vm727_vm4, %v750_v49  ;;  %v1346_v28 = vmul.f32 %v2312_v55, %v1338_v47 }
 0x450   : > { %v756_v51 = vpop.xlane.xlu0 %755  ;;  %v1339_v13 = vld [vmem:[#allocation4 + $0x10] sm:$0xff] }
 0x451   : > { %766 = vst.msk [vmem:[#allocation4 + $0x30] sm:$0xff] %vm727_vm4, %v756_v51  ;;  %v1347_v42 = vmul.f32 %v2316_v57, %v1339_v13 }
 0x452   : > { %1404 = vperm.xlu0 %2267, %v2310_v53  }
 0x454   : > { %v1341_v62 = vld [vmem:[#allocation4 + $0x20] sm:$0xff] }
 0x455   : > { %1409 = vperm.xlu1 %2268, %v2312_v55   ;;  %v1349_v14 = vmul.f32 %v2320_v60, %v1341_v62 }
 0x456   : > { %1419 = vperm.xlu0 %2267, %v2314_v56  }
 0x458   : > { %v1343_v18 = vld [vmem:[#allocation4 + $0x30] sm:$0xff] }
 0x459   : > { %1414 = vperm.xlu1 %2268, %v2316_v57   ;;  %v1351_v25 = vmul.f32 %v2324_v63, %v1343_v18 }
 0x45a   : > { %1429 = vperm.xlu0 %2267, %v2318_v59  }
 0x45d   : > { %1424 = vperm.xlu1 %2268, %v2320_v60  }
 0x45e   : > { %1439 = vperm.xlu0 %2267, %v3209_v61  }
 0x461   : > { %1434 = vperm.xlu1 %2268, %v2324_v63  }
 0x465   : > { %v738_v1 = vpop.xlane.xlu1 %737 }
 0x466   : > { %760 = vst.msk [vmem:[#allocation4] sm:$0xff] %vm727_vm4, %v738_v1 }
 0x469   : > { %v747_v3 = vpop.xlane.xlu1 %746 }
 0x46a   : > { %763 = vst.msk [vmem:[#allocation4 + $0x18] sm:$0xff] %vm727_vm4, %v747_v3 }
 0x46d   : > { %v753_v5 = vpop.xlane.xlu1 %752  ;;  %v1337_v8 = vld [vmem:[#allocation4] sm:$0xff] }
 0x46e   : > { %765 = vst.msk [vmem:[#allocation4 + $0x28] sm:$0xff] %vm727_vm4, %v753_v5  ;;  %v1345_v11 = vmul.f32 %v2310_v53, %v1337_v8 }
 0x471   : > { %v759_v7 = vpop.xlane.xlu1 %758  ;;  %v1340_v52 = vld [vmem:[#allocation4 + $0x18] sm:$0xff] }
 0x472   : > { %767 = vst.msk [vmem:[#allocation4 + $0x38] sm:$0xff] %vm727_vm4, %v759_v7  ;;  %v1348_v58 = vmul.f32 %v2314_v56, %v1340_v52 }
 0x475   : > { %v1342_v22 = vld [vmem:[#allocation4 + $0x28] sm:$0xff] }
 0x476   : > { %v1350_v36 = vmul.f32 %v2318_v59, %v1342_v22 }
 0x479   : > { %v1344_v34 = vld [vmem:[#allocation4 + $0x38] sm:$0xff] }
 0x47a   : > { %v1352_v40 = vmul.f32 %v3209_v61, %v1344_v34  ;;  %v1398_v34 = vld [vmem:[#allocation5 + $0x20] sm:$0xff] }
 0x4b5   : > { %v1355_v12 = vpop.xlane.xlu0 %1354 }
 0x4b6   : > { %v1377_v44 = vadd.f32 %v1355_v12, %v1345_v11 }
 0x4b8   : > { %1386 = vst.msk [vmem:[#allocation4] sm:$0xff] %vm727_vm4, %v1377_v44 }
 0x4b9   : > { %v1361_v45 = vpop.xlane.xlu0 %1360 }
 0x4ba   : > { %v1379_v2 = vadd.f32 %v1361_v45, %v1347_v42 }
 0x4bc   : > { %1388 = vst.msk [vmem:[#allocation4 + $0x10] sm:$0xff] %vm727_vm4, %v1379_v2 }
 0x4bd   : > { %v1358_v6 = vpop.xlane.xlu1 %1357 }
 0x4be   : > { %v1378_v54 = vadd.f32 %v1358_v6, %v1346_v28  ;;  %v1394_v6 = vld [vmem:[#allocation5] sm:$0xff] }
 0x4bf   : > { %v1689_v9 = vld [vmem:[#allocation4] sm:$0xff] }
 0x4c0   : > { %1387 = vst.msk [vmem:[#allocation4 + $0x8] sm:$0xff] %vm727_vm4, %v1378_v54  ;;  %2325 = vrcp.f32 %v1689_v9  ;;  %v1395_v54 = vld [vmem:[#allocation5 + $0x8] sm:$0xff] }
 0x4c1   : > { %v1364_v15 = vpop.xlane.xlu1 %1363 }
 0x4c2   : > { %v1380_v4 = vadd.f32 %v1364_v15, %v1348_v58 }
 0x4c3   : > { %v1691_v10 = vld [vmem:[#allocation4 + $0x10] sm:$0xff] }
 0x4c4   : > { %1389 = vst.msk [vmem:[#allocation4 + $0x18] sm:$0xff] %vm727_vm4, %v1380_v4  ;;  %2327 = vrcp.f32 %v1691_v10 }
 0x4c5   : > { %v1367_v16 = vpop.xlane.xlu0 %1366 }
 0x4c6   : > { %v1381_v17 = vadd.f32 %v1367_v16, %v1349_v14  ;;  %v1396_v14 = vld [vmem:[#allocation5 + $0x10] sm:$0xff] }
 0x4c7   : > { %v1690_v19 = vld [vmem:[#allocation4 + $0x8] sm:$0xff] }
 0x4c8   : > { %1390 = vst.msk [vmem:[#allocation4 + $0x20] sm:$0xff] %vm727_vm4, %v1381_v17  ;;  %2329 = vrcp.f32 %v1690_v19 }
 0x4c9   : > { %v1373_v20 = vpop.xlane.xlu0 %1372 }
 0x4ca   : > { %v2326_v23 = vpop.eup %2325  ;;  %v1383_v26 = vadd.f32 %v1373_v20, %v1351_v25  ;;  %v1397_v25 = vld [vmem:[#allocation5 + $0x18] sm:$0xff] }
 0x4cb   : > { %v1705_v33 = vmul.f32 %v2326_v23, %v1689_v9  ;;  %v1692_v24 = vld [vmem:[#allocation4 + $0x18] sm:$0xff] }
 0x4cc   : > { %1392 = vst.msk [vmem:[#allocation4 + $0x30] sm:$0xff] %vm727_vm4, %v1383_v26  ;;  %2331 = vrcp.f32 %v1692_v24 }
 0x4cd   : > { %v1370_v29 = vpop.xlane.xlu1 %1369  ;;  %v1713_v41 = vsub.f32 2.0, %v1705_v33 }
 0x4ce   : > { %v2328_v39 = vpop.eup %2327  ;;  %v1382_v35 = vadd.f32 %v1370_v29, %v1350_v36 }
 0x4cf   : > { %v1721_v21 = vmul.f32 %v2326_v23, %v1713_v41  ;;  %v1707_v0 = vmul.f32 %v2328_v39, %v1691_v10  ;;  %v1693_v38 = vld [vmem:[#allocation4 + $0x20] sm:$0xff] }
 0x4d0   : > { %1391 = vst.msk [vmem:[#allocation4 + $0x28] sm:$0xff] %vm727_vm4, %v1382_v35  ;;  %2333 = vrcp.f32 %v1693_v38  ;;  %v1399_v35 = vld [vmem:[#allocation5 + $0x28] sm:$0xff] }
 0x4d1   : > { %1739 = vperm.xlu1 %2268, %v1721_v21   ;;  %v1376_v27 = vpop.xlane.xlu1 %1375  ;;  %v1715_v43 = vsub.f32 2.0, %v1707_v0  ;;  %v1405_v28 = vpop.permute.xlu0 %1404 }
 0x4d2   : > { %v2330_v37 = vpop.eup %2329  ;;  %v1384_v46 = vadd.f32 %v1376_v27, %v1352_v40  ;;  %v1442_v52 = vmul.f32 %v1405_v28, %v1394_v6 }
 0x4d3   : > { %v1723_v48 = vmul.f32 %v2328_v39, %v1715_v43  ;;  %v1706_v30 = vmul.f32 %v2330_v37, %v1690_v19  ;;  %v1695_v49 = vld [vmem:[#allocation4 + $0x30] sm:$0xff] }
 0x4d4   : > { %1393 = vst.msk [vmem:[#allocation4 + $0x38] sm:$0xff] %vm727_vm4, %v1384_v46  ;;  %2335 = vrcp.f32 %v1695_v49 }
 0x4d5   : > { %1749 = vperm.xlu1 %2268, %v1723_v48   ;;  %v1714_v50 = vsub.f32 2.0, %v1706_v30  ;;  %v1410_v2 = vpop.permute.xlu1 %1409  ;;  %v1420_v10 = vpop.permute.xlu0 %1419 }
 0x4d6   : > { %v2332_v31 = vpop.eup %2331  ;;  %v1443_v15 = vmul.f32 %v1410_v2, %v1395_v54  ;;  %v1445_v22 = vmul.f32 %v1420_v10, %v1397_v25 }
 0x4d7   : > { %v1722_v51 = vmul.f32 %v2330_v37, %v1714_v50  ;;  %v1708_v53 = vmul.f32 %v2332_v31, %v1692_v24  ;;  %v1694_v32 = vld [vmem:[#allocation4 + $0x28] sm:$0xff]  ;;  %v1400_v37 = vld [vmem:[#allocation5 + $0x30] sm:$0xff]  ;;  %v1401_v50 = vld [vmem:[#allocation5 + $0x38] sm:$0xff] }
 0x4d8   : > { %2337 = vrcp.f32 %v1694_v32 }
 0x4d9   : > { %1744 = vperm.xlu0 %2267, %v1722_v51   ;;  %v1716_v55 = vsub.f32 2.0, %v1708_v53  ;;  %v1415_v9 = vpop.permute.xlu1 %1414  ;;  %v1430_v41 = vpop.permute.xlu0 %1429 }
 0x4da   : > { %v2334_v56 = vpop.eup %2333  ;;  %v1444_v18 = vmul.f32 %v1415_v9, %v1396_v14 }
 0x4db   : > { %v1724_v57 = vmul.f32 %v2332_v31, %v1716_v55  ;;  %v1709_v59 = vmul.f32 %v2334_v56, %v1693_v38  ;;  %v1696_v60 = vld [vmem:[#allocation4 + $0x38] sm:$0xff]  ;;  %v1447_v38 = vmul.f32 %v1430_v41, %v1399_v35 }
 0x4dc   : > { %2339 = vrcp.f32 %v1696_v60 }
 0x4dd   : > { %1754 = vperm.xlu0 %2267, %v1724_v57   ;;  %v1717_v61 = vsub.f32 2.0, %v1709_v59  ;;  %v1425_v29 = vpop.permute.xlu1 %1424  ;;  %v1440_v43 = vpop.permute.xlu0 %1439 }
 0x4de   : > { %v2336_v63 = vpop.eup %2335  ;;  %v1446_v39 = vmul.f32 %v1425_v29, %v1398_v34  ;;  %v1449_v51 = vmul.f32 %v1440_v43, %v1401_v50 }
 0x4df   : > { %v1725_v1 = vmul.f32 %v2334_v56, %v1717_v61  ;;  %v1711_v3 = vmul.f32 %v2336_v63, %v1695_v49 }
 0x4e1   : > { %1759 = vperm.xlu1 %2268, %v1725_v1   ;;  %v1719_v5 = vsub.f32 2.0, %v1711_v3  ;;  %v1435_v21 = vpop.permute.xlu1 %1434 }
 0x4e2   : > { %v2338_v7 = vpop.eup %2337  ;;  %v1448_v48 = vmul.f32 %v1435_v21, %v1400_v37 }
 0x4e3   : > { %v1727_v8 = vmul.f32 %v2336_v63, %v1719_v5  ;;  %v1710_v11 = vmul.f32 %v2338_v7, %v1694_v32 }
 0x4e5   : > { %1769 = vperm.xlu1 %2268, %v1727_v8   ;;  %v1718_v12 = vsub.f32 2.0, %v1710_v11 }
 0x4e6   : > { %v2340_v13 = vpop.eup %2339 }
 0x4e7   : > { %v1726_v44 = vmul.f32 %v2338_v7, %v1718_v12  ;;  %v1712_v42 = vmul.f32 %v2340_v13, %v1696_v60 }
 0x4e9   : > { %1764 = vperm.xlu0 %2267, %v1726_v44   ;;  %v1720_v45 = vsub.f32 2.0, %v1712_v42 }
 0x4eb   : > { %v1728_v47 = vmul.f32 %v2340_v13, %v1720_v45 }
 0x4ed   : > { %1774 = vperm.xlu0 %2267, %v1728_v47  }
 0x504   : > { %v1505_v58 = vpop.f32.mrb[24].mxu0 }
 0x505   : > { %v1662_v62 = vadd.f32 %v1505_v58, %v1442_v52  ;;  %v2155_v4 = vpop.f32.mrb[25].mxu0 }
 0x506   : > { %v1508_v16 = vpop.f32.mrb[26].mxu0 }
 0x507   : > { %1670 = vst.msk [vmem:[#allocation5] sm:$0xff] %vm477_vm1, %v1662_v62  ;;  %v1663_v17 = vadd.f32 %v1508_v16, %v1443_v15  ;;  %v2156_v19 = vpop.f32.mrb[27].mxu0 }
 0x508   : > { %v1555_v20 = vpop.f32.mrb[24].mxu1 }
 0x509   : > { %1671 = vst.msk [vmem:[#allocation5 + $0x8] sm:$0xff] %vm477_vm1, %v1663_v17  ;;  %v1664_v23 = vadd.f32 %v1555_v20, %v1444_v18  ;;  %v2161_v26 = vpop.f32.mrb[25].mxu1 }
 0x50a   : > { %v1558_v33 = vpop.f32.mrb[26].mxu1 }
 0x50b   : > { %1672 = vst.msk [vmem:[#allocation5 + $0x10] sm:$0xff] %vm477_vm1, %v1664_v23  ;;  %v1665_v24 = vadd.f32 %v1558_v33, %v1445_v22  ;;  %v2162_v36 = vpop.f32.mrb[27].mxu1 }
 0x50d   : > { %1673 = vst.msk [vmem:[#allocation5 + $0x18] sm:$0xff] %vm477_vm1, %v1665_v24 }
 0x50e   : > { %v1729_v60 = vld [vmem:[#allocation5] sm:$0xff] }
 0x510   : > { %v1730_v7 = vld [vmem:[#allocation5 + $0x8] sm:$0xff] }
 0x512   : > { %v1731_v63 = vld [vmem:[#allocation5 + $0x10] sm:$0xff] }
 0x514   : > { %v1605_v0 = vpop.f32.mrb[28].mxu0  ;;  %v1732_v11 = vld [vmem:[#allocation5 + $0x18] sm:$0xff] }
 0x515   : > { %v1666_v40 = vadd.f32 %v1605_v0, %v1446_v39  ;;  %v2167_v27 = vpop.f32.mrb[29].mxu0 }
 0x516   : > { %v1608_v46 = vpop.f32.mrb[30].mxu0 }
 0x517   : > { %1674 = vst.msk [vmem:[#allocation5 + $0x20] sm:$0xff] %vm477_vm1, %v1666_v40  ;;  %v1667_v30 = vadd.f32 %v1608_v46, %v1447_v38  ;;  %v2168_v49 = vpop.f32.mrb[31].mxu0 }
 0x518   : > { %v1655_v31 = vpop.f32.mrb[28].mxu1 }
 0x519   : > { %1675 = vst.msk [vmem:[#allocation5 + $0x28] sm:$0xff] %vm477_vm1, %v1667_v30  ;;  %v1668_v53 = vadd.f32 %v1655_v31, %v1448_v48  ;;  %v2173_v32 = vpop.f32.mrb[29].mxu1 }
 0x51a   : > { %v1658_v55 = vpop.f32.mrb[30].mxu1 }
 0x51b   : > { %1676 = vst.msk [vmem:[#allocation5 + $0x30] sm:$0xff] %vm477_vm1, %v1668_v53  ;;  %v1669_v56 = vadd.f32 %v1658_v55, %v1449_v51  ;;  %v2174_v57 = vpop.f32.mrb[31].mxu1 }
 0x51d   : > { %1677 = vst.msk [vmem:[#allocation5 + $0x38] sm:$0xff] %vm477_vm1, %v1669_v56 }
 0x51e   : > { %v1733_v42 = vld [vmem:[#allocation5 + $0x20] sm:$0xff] }
 0x520   : > { %v1734_v52 = vld [vmem:[#allocation5 + $0x28] sm:$0xff] }
 0x522   : > { %v1735_v47 = vld [vmem:[#allocation5 + $0x30] sm:$0xff] }
 0x524   : > { %v1736_v9 = vld [vmem:[#allocation5 + $0x38] sm:$0xff] }
 0x550   : > { %v1740_v59 = vpop.permute.xlu1 %1739 }
 0x551   : > { %v1777_v61 = vmul.f32 %v1740_v59, %v1729_v60 }
 0x553   : > { %1785 = vst.msk [vmem:[%s3234_s17] sm:$0xff] %vm477_vm1, %v1777_v61 }
 0x554   : > { %v1750_v1 = vpop.permute.xlu1 %1749 }
 0x555   : > { %v1779_v3 = vmul.f32 %v1750_v1, %v1731_v63 }
 0x557   : > { %1787 = vst.msk [vmem:[%s3234_s17 + $0x10] sm:$0xff] %vm477_vm1, %v1779_v3 }
 0x558   : > { %v1745_v5 = vpop.permute.xlu0 %1744 }
 0x559   : > { %v1778_v8 = vmul.f32 %v1745_v5, %v1730_v7 }
 0x55b   : > { %1786 = vst.msk [vmem:[%s3234_s17 + $0x8] sm:$0xff] %vm477_vm1, %v1778_v8 }
 0x55c   : > { %v1755_v12 = vpop.permute.xlu0 %1754 }
 0x55d   : > { %v1780_v13 = vmul.f32 %v1755_v12, %v1732_v11 }
 0x55f   : > { %1788 = vst.msk [vmem:[%s3234_s17 + $0x18] sm:$0xff] %vm477_vm1, %v1780_v13 }
 0x560   : > { %v1760_v44 = vpop.permute.xlu1 %1759 }
 0x561   : > { %v1781_v45 = vmul.f32 %v1760_v44, %v1733_v42 }
 0x563   : > { %1789 = vst.msk [vmem:[%s3234_s17 + $0x20] sm:$0xff] %vm477_vm1, %v1781_v45 }
 0x564   : > { %v1770_v2 = vpop.permute.xlu1 %1769 }
 0x565   : > { %v1783_v28 = vmul.f32 %v1770_v2, %v1735_v47 }
 0x567   : > { %1791 = vst.msk [vmem:[%s3234_s17 + $0x30] sm:$0xff] %vm477_vm1, %v1783_v28 }
 0x568   : > { %v1765_v6 = vpop.permute.xlu0 %1764 }
 0x569   : > { %v1782_v54 = vmul.f32 %v1765_v6, %v1734_v52 }
 0x56b   : > { %1790 = vst.msk [vmem:[%s3234_s17 + $0x28] sm:$0xff] %vm477_vm1, %v1782_v54 }
 0x56c   : > { %v1775_v58 = vpop.permute.xlu0 %1774 }
 0x56d   : > { %v1784_v15 = vmul.f32 %v1775_v58, %v1736_v9 }
 0x56f   : > { %1792 = vst.msk [vmem:[%s3234_s17 + $0x38] sm:$0xff] %vm477_vm1, %v1784_v15 }
 0x570   : > { %2472 = shalt.err (!%p2469_p12)
}
 0x571   : > { %s2473_s7 = scalar_lea.hbm %s3255_s5, 1024  ;;  %s2477_s25 = scalar_lea.hbm %s3365_s16, 2048 }
 0x572   : > { %p2474_p11 = scmp.ne.s32.totalorder %s3255_s5, %s2473_s7  ;;  %p2478_p1 = scmp.lt.u32.totalorder %s3255_s5, %s3365_s16 }
 0x573   : > { %p2479_p4 = scmp.lt.u32.totalorder %s2477_s25, %s2473_s7  ;;  %p2481_p5 = scmp.lt.u32.totalorder %s2473_s7, %s3255_s5 }
 0x574   : > { %p2475_p0 = pnand %p2474_p11, %p3366_p10 }
 0x575   : > { %p2480_p2 = por %p2479_p4, %p2478_p1 }
 0x576   : > { %p2476_p9 = pneg %p2475_p0 }
 0x577   : > { %p2482_p13 = por %p2481_p5, %p2480_p2 }
 0x579   : > { %p2483_p7 = pnand %p2482_p13, %p2476_p9 }
 0x57b   : > { %2486 = shalt.err (!%p2483_p7)
}
 0x57c   : > { %s2563_s6 = smov 128   ;;  %s2564_s9 = smov 8  }
 0x57d   : > { %2185 = dma.vmem_to_hbm [thread:$0]  (%p3366_p10), %s3257_s28, 1024, %s3255_s5, %s1794_s23, %s2563_s6, %s2563_s6, %s2564_s9  }
 0x57e PF: > { %s3367_s26 = sld [smem:[#allocation19_spill]]  ;;  %s3368_s27 = sld [smem:[#allocation25_spill]] }
 0x57f   : > { %s3369_s1 = sld [smem:[#allocation21_spill]] }
 0x584   : > { %s1827_s17 = sand.u32 1, %s3367_s26   ;;  %p3370_p3 = scmp.ne.s32.totalorder %s3368_s27, 0 }
 0x585   : > { %p3371_p6 = scmp.ge.s32.totalorder %s3369_s1, 2  ;;  %s1828_s29 = scalar_lea.sflag [#allocation8], %s1827_s17 }
 0x587   : > { %p2202_p8 = pnand %p3371_p6, %p3370_p3 }
 0x589   : > { %2524 = dma.done.wait (!%p2202_p8), %s1828_s29, 1024  }
 0x58a   : > { %2526 = vsyncadd (!%p2202_p8), %s1828_s29, 4294966272  ;;  %s25_s23 = sadd.s32 1, %s3369_s1   ;;  %s3372_s11 = sld [smem:[#allocation23_spill]] }
 0x58b   : > { %p22_p12 = scmp.ge.s32.totalorder %s25_s23, 4   ;;  %s3373_s21 = sld [smem:[#allocation20_spill]] }
 0x58c   : > { %s3374_s22 = sld [smem:[#allocation22_spill]]  ;;  %s3375_s18 = smov %s2533_s19 }
 0x58d   : > { %s3376_s19 = smov %s2537_s20  ;;  %24 = sbr.rel (!%p22_p12) target bundleno = 12 (0xc), region = 125 }
 0x590   : > { %s3377_s20 = smov %s3372_s11 }
 0x594   :  { %1833 = vsyncpa [#allocation7], 1 }
 0x595   :  { %1835 = vsyncpa [#allocation7 + $0x1], 1 }
 0x596   :  { %1836 = vsyncpa [#allocation10], 1 }
 0x597   :  { %1838 = vsyncpa [#allocation10 + $0x1], 1 }
 0x598   :  { %1839 = vsyncpa [#allocation13], 1 }
 0x599   :  { %1840 = vsyncpa [#allocation8], 1 }
 0x59a   :  { %1842 = vsyncpa [#allocation8 + $0x1], 1 }

</bundles_post_ra>
